<compile_context>
chip_gen: v7x
topology: tpu7x:2x2x1
jax: 0.10.0
libtpu: 0.0.40
codegen_flags: <defaults>
</compile_context>

<pallas_src>
import functools
import math

import jax
import jax.numpy as jnp
from jax.experimental import pallas as pl
from jax.experimental.pallas import tpu as pltpu

DOMAIN_CLASS = 3          # args.domain_class
HIDDEN = 768
MID = 384
PAD_OUT = 128             # lane-dense padded output width for the final Linear
NEG_INF = -1e30
TB_TARGET = 1024          # batch tile target (multiple of 16)
SMALL_BATCH = 256         # below this: single tile; above: aim for >=2 tiles (v7x dual-TC)


def _round_up(x, m):
    return ((x + m - 1) // m) * m


def _pick_tile(batch):
    """Rows per batch tile: multiple of 16, capped at TB_TARGET, >=2 tiles for large B."""
    if batch <= SMALL_BATCH:
        return _round_up(max(batch, 16), 16)
    return min(TB_TARGET, _round_up(pl.cdiv(batch, 2), 16))


def _mlp(h_ref, w1_ref, b1_ref, w2_ref, b2_ref, w3_ref, b3_ref):
    """Linear(768,384)+ReLU -> Linear(384,384) -> Linear(384,128pad); f32 accumulation."""
    h = h_ref[...].astype(jnp.bfloat16)                   # fused cast (hidden stays f32 in HBM)
    x1 = jnp.dot(h, w1_ref[...], preferred_element_type=jnp.float32) + b1_ref[...]
    x1 = jnp.maximum(x1, 0.0)
    x2 = jnp.dot(x1.astype(jnp.bfloat16), w2_ref[...],
                 preferred_element_type=jnp.float32) + b2_ref[...]
    logits = jnp.dot(x2.astype(jnp.bfloat16), w3_ref[...],
                     preferred_element_type=jnp.float32) + b3_ref[...]
    return logits                                          # (TB, 128) f32


def domain_clf_kernel_nolabel(h_ref, w1_ref, b1_ref, w2_ref, b2_ref, w3_ref, b3_ref,
                              logits_ref):
    logits = _mlp(h_ref, w1_ref, b1_ref, w2_ref, b2_ref, w3_ref, b3_ref)
    logits_ref[...] = logits.astype(jnp.bfloat16)          # bf16 store: half the write traffic


def domain_clf_kernel_label(h_ref, w1_ref, b1_ref, w2_ref, b2_ref, w3_ref, b3_ref,
                            lbl_ref, logits_ref, loss_ref):
    logits = _mlp(h_ref, w1_ref, b1_ref, w2_ref, b2_ref, w3_ref, b3_ref)
    logits_ref[...] = logits.astype(jnp.bfloat16)

    tb = logits.shape[0]
    col = jax.lax.broadcasted_iota(jnp.int32, (tb, PAD_OUT), 1)
    lbl = lbl_ref[...]                                      # (TB, 1) int32

    # Cross-entropy per row; padded lanes masked only here (stored logits stay clean).
    lm = jnp.where(col < DOMAIN_CLASS, logits, NEG_INF)
    m = jnp.max(lm, axis=-1, keepdims=True)
    lse = m + jnp.log(jnp.sum(jnp.exp(lm - m), axis=-1, keepdims=True))
    tgt = jnp.sum(jnp.where(col == lbl, lm, 0.0), axis=-1, keepdims=True)  # no one-hot temp
    loss_ref[...] = lse - tgt                               # (TB, 1); OOB rows dropped on store


def _const_spec(shape):
    """Resident operand: constant index_map (fetched once); single-buffered when supported."""
    idx = lambda i: (0, 0)
    try:
        return pl.BlockSpec(shape, idx, pipeline_mode=pl.Buffered(1))
    except (TypeError, AttributeError):
        return pl.BlockSpec(shape, idx)


@functools.partial(jax.jit, static_argnames=("has_labels",))
def _run_kernel(params, hidden, labels, has_labels):
    B = hidden.shape[0]
    tb = _pick_tile(B)
    n_tiles = pl.cdiv(B, tb)

    row = lambda i: (i, 0)                                  # batch-tiled operands

    in_specs = [
        pl.BlockSpec((tb, HIDDEN), row),                    # hidden tile (native dtype)
        _const_spec((HIDDEN, MID)),                         # w1
        _const_spec((1, MID)),                              # b1
        _const_spec((MID, MID)),                            # w2
        _const_spec((1, MID)),                              # b2
        _const_spec((MID, PAD_OUT)),                        # w3 (lane-padded)
        _const_spec((1, PAD_OUT)),                          # b3 (lane-padded)
    ]
    cparams = pltpu.CompilerParams(
        dimension_semantics=("parallel",),                  # independent batch tiles
        vmem_limit_bytes=32 * 1024 * 1024,                  # explicit: v5e scoped default is 16 MiB
    )
    args = (hidden, params["w1"], params["b1"], params["w2"], params["b2"],
            params["w3p"], params["b3p"])

    if has_labels:
        lbl = labels.astype(jnp.int32).reshape(-1, 1)
        logits_pad, per_row_loss = pl.pallas_call(
            domain_clf_kernel_label,
            out_shape=(
                jax.ShapeDtypeStruct((B, PAD_OUT), jnp.bfloat16),
                jax.ShapeDtypeStruct((B, 1), jnp.float32),
            ),
            grid=(n_tiles,),
            in_specs=in_specs + [pl.BlockSpec((tb, 1), row)],
            out_specs=(pl.BlockSpec((tb, PAD_OUT), row),
                       pl.BlockSpec((tb, 1), row)),
            compiler_params=cparams,
        )(*args, lbl)
        loss = jnp.sum(per_row_loss) / B                    # global mean (exactly B rows)
        return logits_pad[:, :DOMAIN_CLASS].astype(jnp.float32), loss

    logits_pad = pl.pallas_call(
        domain_clf_kernel_nolabel,
        out_shape=jax.ShapeDtypeStruct((B, PAD_OUT), jnp.bfloat16),
        grid=(n_tiles,),
        in_specs=in_specs,
        out_specs=pl.BlockSpec((tb, PAD_OUT), row),
        compiler_params=cparams,
    )(*args)
    return logits_pad[:, :DOMAIN_CLASS].astype(jnp.float32), None


def init_params(key):
    """PyTorch-Linear-style init (U(-1/sqrt(fan_in), +)).  Weights bf16, biases f32."""
    ks = jax.random.split(key, 6)

    def lin(kw, kb, fan_in, fan_out):
        bound = 1.0 / math.sqrt(fan_in)
        w = jax.random.uniform(kw, (fan_in, fan_out), jnp.float32, -bound, bound)
        b = jax.random.uniform(kb, (1, fan_out), jnp.float32, -bound, bound)
        return w, b

    w1, b1 = lin(ks[0], ks[1], HIDDEN, MID)
    w2, b2 = lin(ks[2], ks[3], MID, MID)
    w3, b3 = lin(ks[4], ks[5], MID, DOMAIN_CLASS)

    # Zero-pad the final layer to PAD_OUT lanes (padded logits stay exactly zero).
    w3p = jnp.zeros((MID, PAD_OUT), jnp.float32).at[:, :DOMAIN_CLASS].set(w3)
    b3p = jnp.zeros((1, PAD_OUT), jnp.float32).at[:, :DOMAIN_CLASS].set(b3)
    return dict(
        w1=w1.astype(jnp.bfloat16), b1=b1,
        w2=w2.astype(jnp.bfloat16), b2=b2,
        w3p=w3p.astype(jnp.bfloat16), b3p=b3p,
    )


def domain_clf_forward(params, hidden, domain_class=None):
    """Equivalent of DomainClf.forward: (predict_domain,) or (predict_domain, loss)."""
    if domain_class is not None:
        logits, loss = _run_kernel(params, hidden, domain_class, has_labels=True)
        return (logits, loss)
    logits, _ = _run_kernel(params, hidden, None, has_labels=False)
    return (logits,)


def _reference(params, hidden, domain_class):
    """Pure-JAX reference with the same bf16-matmul / f32-accumulate / bf16-logit recipe."""
    h = hidden.astype(jnp.bfloat16)
    x = jnp.dot(h, params["w1"], preferred_element_type=jnp.float32) + params["b1"]
    x = jnp.maximum(x, 0.0)
    x = jnp.dot(x.astype(jnp.bfloat16), params["w2"],
                preferred_element_type=jnp.float32) + params["b2"]
    logits_f32 = jnp.dot(x.astype(jnp.bfloat16), params["w3p"],
                         preferred_element_type=jnp.float32) + params["b3p"]
    logits_f32 = logits_f32[:, :DOMAIN_CLASS]
    logp = jax.nn.log_softmax(logits_f32, axis=-1)
    loss = -jnp.mean(jnp.take_along_axis(logp, domain_class[:, None], axis=-1))
    # Kernel stores logits as bf16; quantize the reference the same way for comparison.
    logits = logits_f32.astype(jnp.bfloat16).astype(jnp.float32)
    return logits, loss


# TODO(synk): domain_logit_clf / set_source / cross_entropy_seperate are never used by
# DomainClf.forward(), so they are intentionally not ported.

if __name__ == "__main__":
    key = jax.random.PRNGKey(0)
    kp, kh, kl = jax.random.split(key, 3)

    B = 16
    params = init_params(kp)
    hidden = jax.random.normal(kh, (B, HIDDEN), jnp.float32)
    labels = jax.random.randint(kl, (B,), 0, DOMAIN_CLASS, dtype=jnp.int32)

    # Path with labels: (predict_domain, loss)
    predict_domain, loss = domain_clf_forward(params, hidden, labels)
    predict_domain = jax.block_until_ready(predict_domain)
    loss = jax.block_until_ready(loss)

    # Path without labels: (predict_domain,)
    (predict_only,) = domain_clf_forward(params, hidden, None)
    predict_only = jax.block_until_ready(predict_only)

    # Verify against pure-JAX reference
    ref_logits, ref_loss = _reference(params, hidden, labels)
    assert predict_domain.shape == (B, DOMAIN_CLASS)
    assert jnp.allclose(predict_domain, ref_logits, atol=2e-2, rtol=2e-2)
    assert jnp.allclose(predict_only, ref_logits, atol=2e-2, rtol=2e-2)
    assert jnp.allclose(loss, ref_loss, atol=2e-3, rtol=2e-3)

    print("KERNEL_OK")
</pallas_src>

<mosaic_0001>
module attributes {stable_mosaic.version = 11 : i64} {
  func.func @domain_clf_kernel_label(%arg0: i32, %arg1: memref<16x768xf32, #tpu.memory_space<vmem>>, %arg2: memref<768x384xbf16, #tpu.memory_space<vmem>>, %arg3: memref<1x384xf32, #tpu.memory_space<vmem>>, %arg4: memref<384x384xbf16, #tpu.memory_space<vmem>>, %arg5: memref<1x384xf32, #tpu.memory_space<vmem>>, %arg6: memref<384x128xbf16, #tpu.memory_space<vmem>>, %arg7: memref<1x128xf32, #tpu.memory_space<vmem>>, %arg8: memref<16x1xi32, #tpu.memory_space<vmem>>, %arg9: memref<16x128xbf16, #tpu.memory_space<vmem>>, %arg10: memref<16x1xf32, #tpu.memory_space<vmem>>) attributes {dimension_semantics = [#tpu.dimension_semantics<parallel>], iteration_bounds = array<i64: 1>, scalar_prefetch = 0 : i64, scratch_operands = 0 : i64, tpu.core_type = #tpu.core_type<tc>, window_params = [{transform_indices = @transform_0, window_bounds = array<i64: 16, 768>}, {pipeline_mode = #tpu.pipeline_mode<synchronous>, transform_indices = @transform_1, window_bounds = array<i64: 768, 384>}, {pipeline_mode = #tpu.pipeline_mode<synchronous>, transform_indices = @transform_2, window_bounds = array<i64: 1, 384>}, {pipeline_mode = #tpu.pipeline_mode<synchronous>, transform_indices = @transform_3, window_bounds = array<i64: 384, 384>}, {pipeline_mode = #tpu.pipeline_mode<synchronous>, transform_indices = @transform_4, window_bounds = array<i64: 1, 384>}, {pipeline_mode = #tpu.pipeline_mode<synchronous>, transform_indices = @transform_5, window_bounds = array<i64: 384, 128>}, {pipeline_mode = #tpu.pipeline_mode<synchronous>, transform_indices = @transform_6, window_bounds = array<i64: 1, 128>}, {transform_indices = @transform_7, window_bounds = array<i64: 16, 1>}, {transform_indices = @transform_8, window_bounds = array<i64: 16, 128>}, {transform_indices = @transform_9, window_bounds = array<i64: 16, 1>}]} {
    %c0 = arith.constant 0 : index
    %c0_0 = arith.constant 0 : index
    %0 = vector.load %arg1[%c0, %c0_0] : memref<16x768xf32, #tpu.memory_space<vmem>>, vector<16x768xf32>
    %1 = arith.truncf %0 : vector<16x768xf32> to vector<16x768xbf16>
    %c0_1 = arith.constant 0 : index
    %c0_2 = arith.constant 0 : index
    %2 = vector.load %arg2[%c0_1, %c0_2] : memref<768x384xbf16, #tpu.memory_space<vmem>>, vector<768x384xbf16>
    %cst = arith.constant dense<0.000000e+00> : vector<16x384xf32>
    %3 = tpu.matmul %1, %2, %cst {dimension_numbers = #tpu.dot_dimension_numbers<[1], [0], [0], [1], [0, 0, 1, 1], [], []>} : vector<16x768xbf16>, vector<768x384xbf16>, vector<16x384xf32> -> vector<16x384xf32>
    %c0_3 = arith.constant 0 : index
    %c0_4 = arith.constant 0 : index
    %4 = vector.load %arg3[%c0_3, %c0_4] : memref<1x384xf32, #tpu.memory_space<vmem>>, vector<1x384xf32>
    %5 = vector.broadcast %4 : vector<1x384xf32> to vector<16x384xf32>
    %6 = arith.addf %3, %5 : vector<16x384xf32>
    %cst_5 = arith.constant 0.000000e+00 : f32
    %7 = vector.broadcast %cst_5 : f32 to vector<16x384xf32>
    %8 = arith.maximumf %6, %7 : vector<16x384xf32>
    %9 = arith.truncf %8 : vector<16x384xf32> to vector<16x384xbf16>
    %c0_6 = arith.constant 0 : index
    %c0_7 = arith.constant 0 : index
    %10 = vector.load %arg4[%c0_6, %c0_7] : memref<384x384xbf16, #tpu.memory_space<vmem>>, vector<384x384xbf16>
    %cst_8 = arith.constant dense<0.000000e+00> : vector<16x384xf32>
    %11 = tpu.matmul %9, %10, %cst_8 {dimension_numbers = #tpu.dot_dimension_numbers<[1], [0], [0], [1], [0, 0, 1, 1], [], []>} : vector<16x384xbf16>, vector<384x384xbf16>, vector<16x384xf32> -> vector<16x384xf32>
    %c0_9 = arith.constant 0 : index
    %c0_10 = arith.constant 0 : index
    %12 = vector.load %arg5[%c0_9, %c0_10] : memref<1x384xf32, #tpu.memory_space<vmem>>, vector<1x384xf32>
    %13 = vector.broadcast %12 : vector<1x384xf32> to vector<16x384xf32>
    %14 = arith.addf %11, %13 : vector<16x384xf32>
    %15 = arith.truncf %14 : vector<16x384xf32> to vector<16x384xbf16>
    %c0_11 = arith.constant 0 : index
    %c0_12 = arith.constant 0 : index
    %16 = vector.load %arg6[%c0_11, %c0_12] : memref<384x128xbf16, #tpu.memory_space<vmem>>, vector<384x128xbf16>
    %cst_13 = arith.constant dense<0.000000e+00> : vector<16x128xf32>
    %17 = tpu.matmul %15, %16, %cst_13 {dimension_numbers = #tpu.dot_dimension_numbers<[1], [0], [0], [1], [0, 0, 1, 1], [], []>} : vector<16x384xbf16>, vector<384x128xbf16>, vector<16x128xf32> -> vector<16x128xf32>
    %c0_14 = arith.constant 0 : index
    %c0_15 = arith.constant 0 : index
    %18 = vector.load %arg7[%c0_14, %c0_15] : memref<1x128xf32, #tpu.memory_space<vmem>>, vector<1x128xf32>
    %19 = vector.broadcast %18 : vector<1x128xf32> to vector<16x128xf32>
    %20 = arith.addf %17, %19 : vector<16x128xf32>
    %21 = arith.truncf %20 : vector<16x128xf32> to vector<16x128xbf16>
    %c0_16 = arith.constant 0 : index
    %c0_17 = arith.constant 0 : index
    %22 = vector.load %arg9[%c0_16, %c0_17] : memref<16x128xbf16, #tpu.memory_space<vmem>>, vector<16x128xbf16>
    tpu.vector_store %arg9[%c0_16, %c0_17], %21 {strides = array<i32>} : memref<16x128xbf16, #tpu.memory_space<vmem>>, vector<16x128xbf16>,
    %23 = tpu.iota {dimensions = array<i32: 1>} : vector<16x128xi32>
    %c0_18 = arith.constant 0 : index
    %c0_19 = arith.constant 0 : index
    %24 = vector.load %arg8[%c0_18, %c0_19] : memref<16x1xi32, #tpu.memory_space<vmem>>, vector<16x1xi32>
    %c3_i32 = arith.constant 3 : i32
    %25 = vector.broadcast %c3_i32 : i32 to vector<16x128xi32>
    %26 = arith.cmpi slt, %23, %25 : vector<16x128xi32>
    %cst_20 = arith.constant -1.000000e+30 : f32
    %27 = vector.broadcast %cst_20 : f32 to vector<16x128xf32>
    %28 = arith.select %26, %20, %27 : vector<16x128xi1>, vector<16x128xf32>
    %cst_21 = arith.constant dense<0xFF800000> : vector<16xf32>
    %29 = vector.multi_reduction <maximumf>, %28, %cst_21 [1] : vector<16x128xf32> to vector<16xf32>
    %30 = vector.shape_cast %29 : vector<16xf32> to vector<16x1xf32>
    %31 = vector.broadcast %30 : vector<16x1xf32> to vector<16x128xf32>
    %32 = arith.subf %28, %31 : vector<16x128xf32>
    %33 = math.exp %32 : vector<16x128xf32>
    %cst_22 = arith.constant dense<0.000000e+00> : vector<16xf32>
    %34 = vector.multi_reduction <add>, %33, %cst_22 [1] : vector<16x128xf32> to vector<16xf32>
    %35 = vector.shape_cast %34 : vector<16xf32> to vector<16x1xf32>
    %36 = math.log %35 : vector<16x1xf32>
    %37 = arith.addf %30, %36 : vector<16x1xf32>
    %38 = vector.broadcast %24 : vector<16x1xi32> to vector<16x128xi32>
    %39 = arith.cmpi eq, %23, %38 : vector<16x128xi32>
    %cst_23 = arith.constant 0.000000e+00 : f32
    %40 = vector.broadcast %cst_23 : f32 to vector<16x128xf32>
    %41 = arith.select %39, %28, %40 : vector<16x128xi1>, vector<16x128xf32>
    %cst_24 = arith.constant dense<0.000000e+00> : vector<16xf32>
    %42 = vector.multi_reduction <add>, %41, %cst_24 [1] : vector<16x128xf32> to vector<16xf32>
    %43 = vector.shape_cast %42 : vector<16xf32> to vector<16x1xf32>
    %44 = arith.subf %37, %43 : vector<16x1xf32>
    %c0_25 = arith.constant 0 : index
    %c0_26 = arith.constant 0 : index
    %45 = vector.load %arg10[%c0_25, %c0_26] : memref<16x1xf32, #tpu.memory_space<vmem>>, vector<16x1xf32>
    tpu.vector_store %arg10[%c0_25, %c0_26], %44 {strides = array<i32>} : memref<16x1xf32, #tpu.memory_space<vmem>>, vector<16x1xf32>,
    return
  }
  func.func @transform_0(%arg0: i32) -> (i32, i32) {
    %c0_i32 = arith.constant 0 : i32
    %c0_i32_0 = arith.constant 0 : i32
    return %arg0, %c0_i32 : i32, i32
  }
  func.func @transform_1(%arg0: i32) -> (i32, i32) {
    %c0_i32 = arith.constant 0 : i32
    %c0_i32_0 = arith.constant 0 : i32
    %c0_i32_1 = arith.constant 0 : i32
    return %c0_i32, %c0_i32_0 : i32, i32
  }
  func.func @transform_2(%arg0: i32) -> (i32, i32) {
    %c0_i32 = arith.constant 0 : i32
    %c0_i32_0 = arith.constant 0 : i32
    %c0_i32_1 = arith.constant 0 : i32
    return %c0_i32, %c0_i32_0 : i32, i32
  }
  func.func @transform_3(%arg0: i32) -> (i32, i32) {
    %c0_i32 = arith.constant 0 : i32
    %c0_i32_0 = arith.constant 0 : i32
    %c0_i32_1 = arith.constant 0 : i32
    return %c0_i32, %c0_i32_0 : i32, i32
  }
  func.func @transform_4(%arg0: i32) -> (i32, i32) {
    %c0_i32 = arith.constant 0 : i32
    %c0_i32_0 = arith.constant 0 : i32
    %c0_i32_1 = arith.constant 0 : i32
    return %c0_i32, %c0_i32_0 : i32, i32
  }
  func.func @transform_5(%arg0: i32) -> (i32, i32) {
    %c0_i32 = arith.constant 0 : i32
    %c0_i32_0 = arith.constant 0 : i32
    %c0_i32_1 = arith.constant 0 : i32
    return %c0_i32, %c0_i32_0 : i32, i32
  }
  func.func @transform_6(%arg0: i32) -> (i32, i32) {
    %c0_i32 = arith.constant 0 : i32
    %c0_i32_0 = arith.constant 0 : i32
    %c0_i32_1 = arith.constant 0 : i32
    return %c0_i32, %c0_i32_0 : i32, i32
  }
  func.func @transform_7(%arg0: i32) -> (i32, i32) {
    %c0_i32 = arith.constant 0 : i32
    %c0_i32_0 = arith.constant 0 : i32
    return %arg0, %c0_i32 : i32, i32
  }
  func.func @transform_8(%arg0: i32) -> (i32, i32) {
    %c0_i32 = arith.constant 0 : i32
    %c0_i32_0 = arith.constant 0 : i32
    return %arg0, %c0_i32 : i32, i32
  }
  func.func @transform_9(%arg0: i32) -> (i32, i32) {
    %c0_i32 = arith.constant 0 : i32
    %c0_i32_0 = arith.constant 0 : i32
    return %arg0, %c0_i32 : i32, i32
  }
}

</mosaic_0001>

<bundles_post_ra>
// kernel: _run_kernel.1
= control target key start
LH: loop header
LB: loop body
LE: loop exit
PB: predicated region body
PF: predicated region fallthrough
CT: control target
= control target key end

     0   :  { %15 = vsyncpa [#allocation3], 0  ;;  %s3425_s0 = inlined_call_operand.hbm [shape: f32[16,768], index: 0, kind: input, shape index: {}]   ;;  %s3426_s1 = inlined_call_operand.hbm [shape: bf16[768,384], index: 1, kind: input, shape index: {}]   ;;  %s3427_s2 = inlined_call_operand.vmem [shape: f32[1,384], index: 2, kind: input, shape index: {}]   ;;  %s3428_s3 = inlined_call_operand.hbm [shape: bf16[384,384], index: 3, kind: input, shape index: {}]   ;;  %s3429_s4 = inlined_call_operand.vmem [shape: f32[1,384], index: 4, kind: input, shape index: {}]   ;;  %s3430_s5 = inlined_call_operand.hbm [shape: bf16[384,128], index: 5, kind: input, shape index: {}]   ;;  %s3431_s6 = inlined_call_operand.vmem [shape: f32[1,128], index: 6, kind: input, shape index: {}]   ;;  %s3432_s7 = inlined_call_operand.vmem [shape: s32[16,1], index: 7, kind: input, shape index: {}]   ;;  %s3433_s8 = inlined_call_operand.vmem [shape: bf16[16,128], index: 8, kind: output, shape index: {0}]   ;;  %s3434_s9 = inlined_call_operand.vmem [shape: f32[16,1], index: 9, kind: output, shape index: {1}]  }
   0x1   :  { %16 = vsyncpa [#allocation5], 0 }
   0x2   :  { %17 = vsyncpa [#allocation8], 0  ;;  %s3226_s30 = smov [#allocation4]   ;;  %s3132_s13 = scalar_lea.hbm %s3426_s1, 18432 }
   0x3   :  { %s35_s10 = sshll.u32 %s3226_s30, 4  ;;  %p3133_p0 = scmp.ne.s32.totalorder %s3426_s1, %s3132_s13  ;;  %s36_s10 = int_to_ptr.vmem [resolvable:$true] %s35_s10 }
   0x4   :  { %p3136_p1 = scmp.lt.u32.totalorder %s3132_s13, %s3426_s1 }
   0x6   :  { %p3138_p2 = pnand %p3136_p1, %p3133_p0 }
   0x8   :  { %3141 = shalt.err (!%p3138_p2)
}
   0x9   :  { %s3142_s18 = scalar_lea.vmem %s36_s10, 18432  ;;  %p3147_p4 = scmp.lt.s32.totalorder %s36_s10, %s36_s10 }
   0xa   :  { %p3143_p3 = scmp.ne.s32.totalorder %s36_s10, %s3142_s18  ;;  %p3148_p5 = scmp.lt.s32.totalorder %s3142_s18, %s3142_s18 }
   0xc   :  { %p3149_p6 = por %p3148_p5, %p3147_p4 }
   0xe   :  { %p3150_p7 = pnand %p3149_p6, %p3143_p3 }
  0x10   :  { %3153 = shalt.err (!%p3150_p7)
}
  0x11   :  { %s3227_s19 = smov 192   ;;  %s3228_s20 = smov 12  }
  0x12   :  { %41 = dma.hbm_to_vmem [thread:$0]  %s3426_s1, 18432, %s36_s10, [#allocation5], %s3227_s19, %s3227_s19, %s3228_s20  }
  0x13   :  { %s3229_s23 = smov [#allocation2]   ;;  %s3154_s27 = scalar_lea.hbm %s3425_s0, 1536 }
  0x14   :  { %s23_s24 = sshll.u32 %s3229_s23, 4  ;;  %p3155_p8 = scmp.ne.s32.totalorder %s3425_s0, %s3154_s27  ;;  %s24_s24 = int_to_ptr.vmem [resolvable:$true] %s23_s24 }
  0x15   :  { %p3158_p9 = scmp.lt.u32.totalorder %s3154_s27, %s3425_s0 }
  0x17   :  { %p3160_p10 = pnand %p3158_p9, %p3155_p8 }
  0x19   :  { %3163 = shalt.err (!%p3160_p10)
}
  0x1a   :  { %s3164_s12 = scalar_lea.vmem %s24_s24, 1536  ;;  %p3169_p12 = scmp.lt.s32.totalorder %s24_s24, %s24_s24 }
  0x1b   :  { %p3165_p11 = scmp.ne.s32.totalorder %s24_s24, %s3164_s12  ;;  %p3170_p13 = scmp.lt.s32.totalorder %s3164_s12, %s3164_s12 }
  0x1d   :  { %p3171_p0 = por %p3170_p13, %p3169_p12 }
  0x1f   :  { %p3172_p1 = pnand %p3171_p0, %p3165_p11 }
  0x21   :  { %3175 = shalt.err (!%p3172_p1)
}
  0x22   :  { %s3230_s1 = smov 768   ;;  %s3231_s10 = smov 48  }
  0x23   :  { %29 = dma.hbm_to_vmem [thread:$0]  %s3425_s0, 1536, %s24_s24, [#allocation3], %s3230_s1, %s3230_s1, %s3231_s10  }
  0x24   :  { %s3232_s15 = smov [#allocation6]   ;;  %s3233_s17 = smov [#allocation7]  }
  0x25   :  { %s49_s16 = sshll.u32 %s3232_s15, 4  ;;  %s63_s18 = sshll.u32 %s3233_s17, 4  ;;  %s50_s16 = int_to_ptr.vmem [resolvable:$true] %s49_s16  ;;  %s3316_s18 = int_to_ptr.vmem [resolvable:$true] %s63_s18 }
  0x26   :  { %s3176_s23 = scalar_lea.hbm %s3428_s3, 9216 }
  0x27   :  { %p3177_p2 = scmp.ne.s32.totalorder %s3428_s3, %s3176_s23  ;;  %p3180_p3 = scmp.lt.u32.totalorder %s3176_s23, %s3428_s3 }
  0x29   :  { %p3182_p4 = pnand %p3180_p3, %p3177_p2 }
  0x2b   :  { %3185 = shalt.err (!%p3182_p4)
}
  0x2c   :  { %s3186_s0 = scalar_lea.vmem %s50_s16, 9216  ;;  %p3191_p6 = scmp.lt.s32.totalorder %s50_s16, %s50_s16 }
  0x2d   :  { %p3187_p5 = scmp.ne.s32.totalorder %s50_s16, %s3186_s0  ;;  %p3192_p7 = scmp.lt.s32.totalorder %s3186_s0, %s3186_s0 }
  0x2f   :  { %p3193_p8 = por %p3192_p7, %p3191_p6 }
  0x31   :  { %p3194_p9 = pnand %p3193_p8, %p3187_p5 }
  0x33   :  { %3197 = shalt.err (!%p3194_p9)
}
  0x34   :  { %55 = dma.hbm_to_vmem [thread:$0]  %s3428_s3, 9216, %s50_s16, [#allocation5], %s3227_s19, %s3227_s19, %s3228_s20  }
  0x35   :  { %s3198_s12 = scalar_lea.hbm %s3430_s5, 3072 }
  0x36   :  { %p3199_p10 = scmp.ne.s32.totalorder %s3430_s5, %s3198_s12  ;;  %p3202_p11 = scmp.lt.u32.totalorder %s3198_s12, %s3430_s5 }
  0x38   :  { %p3204_p12 = pnand %p3202_p11, %p3199_p10 }
  0x3a   :  { %3207 = shalt.err (!%p3204_p12)
}
  0x3b   :  { %s3208_s15 = scalar_lea.vmem %s3316_s18, 3072  ;;  %p3213_p0 = scmp.lt.s32.totalorder %s3316_s18, %s3316_s18 }
  0x3c   :  { %p3209_p13 = scmp.ne.s32.totalorder %s3316_s18, %s3208_s15  ;;  %p3214_p1 = scmp.lt.s32.totalorder %s3208_s15, %s3208_s15 }
  0x3e   :  { %p3215_p2 = por %p3214_p1, %p3213_p0 }
  0x40   :  { %p3216_p3 = pnand %p3215_p2, %p3209_p13 }
  0x42   :  { %3219 = shalt.err (!%p3216_p3)
}
  0x43   :  { %s3234_s3 = smov 64   ;;  %s3235_s19 = smov 4  }
  0x44   :  { %69 = dma.hbm_to_vmem [thread:$0]  %s3430_s5, 3072, %s3316_s18, [#allocation8], %s3234_s3, %s3234_s3, %s3235_s19  }
  0x45   :  { %3220 = dma.done.wait [#allocation3], 1536  }
  0x46   :  { %3221 = vsyncadd [#allocation3], 4294965760 }
  0x47   :  { %3222 = dma.done.wait [#allocation5], 27648  }
  0x48   :  { %3223 = vsyncadd [#allocation5], 4294939648 }
  0x49   :  { %3224 = dma.done.wait [#allocation8], 3072  }
  0x4a   :  { %3225 = vsyncadd [#allocation8], 4294964224  ;;  %v2812_v0 = vld [vmem:[#allocation4 + $0x4] ss:$12 sps:$4 sm:$0xff]   ;;  %v2814_v1 = vld [vmem:[#allocation4] ss:$12 sps:$4 sm:$0xff]  }
  0x4b   :  { %1082 = vmatprep.subr.bf16.mxu0 %v2812_v0  ;;  %v2815_v2 = vld [vmem:[#allocation4 + $0x1c] ss:$12 sps:$4 sm:$0xff]   ;;  %v2817_v3 = vld [vmem:[#allocation4 + $0x18] ss:$12 sps:$4 sm:$0xff]   ;;  %v2818_v4 = vld [vmem:[#allocation4 + $0x34] ss:$12 sps:$4 sm:$0xff]  }
  0x4c   :  { %1083 = vmatpush1.bf16.msra.mxu0 %v2814_v1  ;;  %v2820_v5 = vld [vmem:[#allocation4 + $0x30] ss:$12 sps:$4 sm:$0xff]   ;;  %v2821_v6 = vld [vmem:[#allocation4 + $0x4c] ss:$12 sps:$4 sm:$0xff]   ;;  %v2823_v7 = vld [vmem:[#allocation4 + $0x48] ss:$12 sps:$4 sm:$0xff]  }
  0x4d   :  { %1084 = vmatprep.subr.bf16.mxu0 %v2815_v2  ;;  %v2824_v8 = vld [vmem:[#allocation4 + $0x64] ss:$12 sps:$4 sm:$0xff]   ;;  %v2826_v9 = vld [vmem:[#allocation4 + $0x60] ss:$12 sps:$4 sm:$0xff]   ;;  %v2827_v10 = vld [vmem:[#allocation4 + $0x7c] ss:$12 sps:$4 sm:$0xff]  }
  0x4e   :  { %v2829_v11 = vld [vmem:[#allocation4 + $0x78] ss:$12 sps:$4 sm:$0xff]   ;;  %v2830_v12 = vld [vmem:[#allocation4 + $0x94] ss:$12 sps:$4 sm:$0xff]   ;;  %v88_v13 = vld [vmem:[#allocation2 + $0x8] sm:$0xff]  ;;  %vm3238_vm0 = vmmov 0  }
  0x4f   :  { %v94_v14 = vld [vmem:[#allocation2 + $0x38] sm:$0xff]  ;;  %v2863_v18 = vld [vmem:[#allocation4 + $0xc8] ss:$12 sps:$4 sm:$0xff]   ;;  %v2836_v21 = vld [vmem:[#allocation4 + $0xc4] ss:$12 sps:$4 sm:$0xff]   ;;  %vm2345_vm4 = vcmask 7168  }
  0x50   :  { %1085 = vmatpush1.bf16.msra.mxu0 %v2817_v3  ;;  %v100_v15 = vpack.c.bf16 %v94_v14, %v88_v13  ;;  %v2832_v16 = vld [vmem:[#allocation4 + $0x90] ss:$12 sps:$4 sm:$0xff]   ;;  %v2833_v17 = vld [vmem:[#allocation4 + $0xac] ss:$12 sps:$4 sm:$0xff]   ;;  %v2864_v19 = vld [vmem:[#allocation4 + $0x8] ss:$12 sps:$4 sm:$0xff]   ;;  %2609 = vmatprep.subr.bf16.mxu1 %v2863_v18 }
  0x51   :  { %1086 = vmatprep.subr.bf16.mxu0 %v2818_v4  ;;  %v2835_v20 = vld [vmem:[#allocation4 + $0xa8] ss:$12 sps:$4 sm:$0xff]   ;;  %2610 = vmatpush3.bf16.msra.mxu1 %v2864_v19  ;;  %v2868_v22 = vld [vmem:[#allocation4 + $0xe0] ss:$12 sps:$4 sm:$0xff]   ;;  %v2873_v26 = vld [vmem:[#allocation4 + $0xf8] ss:$12 sps:$4 sm:$0xff]  }
  0x52   :  { %1114 = vmatprep.mubr.bf16.mxu0 %v100_v15  ;;  %1243 = vmatprep.mubr.bf16.mxu1 %v100_v15  ;;  %v2869_v23 = vld [vmem:[#allocation4 + $0x20] ss:$12 sps:$4 sm:$0xff]   ;;  %v2839_v25 = vld [vmem:[#allocation4 + $0xdc] ss:$12 sps:$4 sm:$0xff]   ;;  %v2874_v27 = vld [vmem:[#allocation4 + $0x38] ss:$12 sps:$4 sm:$0xff]  }
  0x53   :  { %v2838_v24 = vld [vmem:[#allocation4 + $0xc0] ss:$12 sps:$4 sm:$0xff]   ;;  %2611 = vmatprep.subr.bf16.mxu1 %v2868_v22  ;;  %v2841_v28 = vld [vmem:[#allocation4 + $0xd8] ss:$12 sps:$4 sm:$0xff]   ;;  %v2878_v29 = vld [vmem:[#allocation4 + $0x110] ss:$12 sps:$4 sm:$0xff]  }
  0x54   :  { %1087 = vmatpush1.bf16.msra.mxu0 %v2820_v5  ;;  %v2879_v30 = vld [vmem:[#allocation4 + $0x50] ss:$12 sps:$4 sm:$0xff]   ;;  %v2842_v31 = vld [vmem:[#allocation4 + $0xf4] ss:$12 sps:$4 sm:$0xff]   ;;  %v2845_v35 = vld [vmem:[#allocation4 + $0x10c] ss:$12 sps:$4 sm:$0xff]  }
  0x55   :  { %1088 = vmatprep.subr.bf16.mxu0 %v2821_v6  ;;  %2612 = vmatpush3.bf16.msra.mxu1 %v2869_v23  ;;  %v2844_v32 = vld [vmem:[#allocation4 + $0xf0] ss:$12 sps:$4 sm:$0xff]   ;;  %v2883_v33 = vld [vmem:[#allocation4 + $0x128] ss:$12 sps:$4 sm:$0xff]   ;;  %v2888_v36 = vld [vmem:[#allocation4 + $0x140] ss:$12 sps:$4 sm:$0xff]  }
  0x56   :  { %2613 = vmatprep.subr.bf16.mxu1 %v2873_v26  ;;  %v2884_v34 = vld [vmem:[#allocation4 + $0x68] ss:$12 sps:$4 sm:$0xff]   ;;  %v2848_v38 = vld [vmem:[#allocation4 + $0x124] ss:$12 sps:$4 sm:$0xff]   ;;  %v2889_v39 = vld [vmem:[#allocation4 + $0x80] ss:$12 sps:$4 sm:$0xff]  }
  0x57   :  { %v2847_v37 = vld [vmem:[#allocation4 + $0x108] ss:$12 sps:$4 sm:$0xff]   ;;  %v2893_v40 = vld [vmem:[#allocation4 + $0x158] ss:$12 sps:$4 sm:$0xff]   ;;  %v2850_v41 = vld [vmem:[#allocation4 + $0x120] ss:$12 sps:$4 sm:$0xff]  }
  0x58   :  { %1089 = vmatpush1.bf16.msra.mxu0 %v2823_v7  ;;  %v2851_v42 = vld [vmem:[#allocation4 + $0x13c] ss:$12 sps:$4 sm:$0xff]   ;;  %v2894_v43 = vld [vmem:[#allocation4 + $0x98] ss:$12 sps:$4 sm:$0xff]   ;;  %v2854_v46 = vld [vmem:[#allocation4 + $0x154] ss:$12 sps:$4 sm:$0xff]  }
  0x59   :  { %1090 = vmatprep.subr.bf16.mxu0 %v2824_v8  ;;  %2614 = vmatpush3.bf16.msra.mxu1 %v2874_v27  ;;  %v2898_v44 = vld [vmem:[#allocation4 + $0x170] ss:$12 sps:$4 sm:$0xff]   ;;  %v2853_v45 = vld [vmem:[#allocation4 + $0x138] ss:$12 sps:$4 sm:$0xff]   ;;  %v2903_v48 = vld [vmem:[#allocation4 + $0x248] ss:$12 sps:$4 sm:$0xff]  }
  0x5a   :  { %2615 = vmatprep.subr.bf16.mxu1 %v2878_v29  ;;  %v2899_v47 = vld [vmem:[#allocation4 + $0xb0] ss:$12 sps:$4 sm:$0xff]   ;;  %v87_v50 = vld [vmem:[#allocation2] sm:$0xff]  ;;  %v2857_v52 = vld [vmem:[#allocation4 + $0x16c] ss:$12 sps:$4 sm:$0xff]  }
  0x5b   :  { %v2856_v49 = vld [vmem:[#allocation4 + $0x150] ss:$12 sps:$4 sm:$0xff]   ;;  %v2904_v53 = vld [vmem:[#allocation4 + $0x188] ss:$12 sps:$4 sm:$0xff]   ;;  %v2908_v55 = vld [vmem:[#allocation4 + $0x260] ss:$12 sps:$4 sm:$0xff]  }
  0x5c   :  { %1091 = vmatpush1.bf16.msra.mxu0 %v2826_v9  ;;  %v93_v51 = vld [vmem:[#allocation2 + $0x30] sm:$0xff]  ;;  %v2909_v57 = vld [vmem:[#allocation4 + $0x1a0] ss:$12 sps:$4 sm:$0xff]   ;;  %v2913_v59 = vld [vmem:[#allocation4 + $0x278] ss:$12 sps:$4 sm:$0xff]  }
  0x5d   :  { %1092 = vmatprep.subr.bf16.mxu0 %v2827_v10  ;;  %2616 = vmatpush3.bf16.msra.mxu1 %v2879_v30  ;;  %v99_v54 = vpack.c.bf16 %v93_v51, %v87_v50  ;;  %v2859_v56 = vld [vmem:[#allocation4 + $0x168] ss:$12 sps:$4 sm:$0xff]   ;;  %v2862_v58 = vld [vmem:[#allocation4 + $0x184] ss:$12 sps:$4 sm:$0xff]   ;;  %v2860_v60 = vld [vmem:[#allocation4 + $0x180] ss:$12 sps:$4 sm:$0xff]  }
  0x5e   :  { %2617 = vmatprep.subr.bf16.mxu1 %v2883_v33  ;;  %v2867_v61 = vld [vmem:[#allocation4 + $0x19c] ss:$12 sps:$4 sm:$0xff]   ;;  %v2914_v62 = vld [vmem:[#allocation4 + $0x1b8] ss:$12 sps:$4 sm:$0xff]   ;;  %v2872_v1 = vld [vmem:[#allocation4 + $0x1b4] ss:$12 sps:$4 sm:$0xff]  }
  0x5f   :  { %v2918_v63 = vld [vmem:[#allocation4 + $0x290] ss:$12 sps:$4 sm:$0xff]   ;;  %v2865_v0 = vld [vmem:[#allocation4 + $0x198] ss:$12 sps:$4 sm:$0xff]   ;;  %v2923_v3 = vld [vmem:[#allocation4 + $0x2a8] ss:$12 sps:$4 sm:$0xff]  }
  0x60   :  { %1093 = vmatpush1.bf16.msra.mxu0 %v2829_v11  ;;  %v2919_v2 = vld [vmem:[#allocation4 + $0x1d0] ss:$12 sps:$4 sm:$0xff]   ;;  %v2877_v5 = vld [vmem:[#allocation4 + $0x1cc] ss:$12 sps:$4 sm:$0xff]   ;;  %v2924_v6 = vld [vmem:[#allocation4 + $0x1e8] ss:$12 sps:$4 sm:$0xff]  }
  0x61   :  { %1094 = vmatprep.subr.bf16.mxu0 %v2830_v12  ;;  %2618 = vmatpush3.bf16.msra.mxu1 %v2884_v34  ;;  %v2870_v4 = vld [vmem:[#allocation4 + $0x1b0] ss:$12 sps:$4 sm:$0xff]   ;;  %v2928_v7 = vld [vmem:[#allocation4 + $0x2c0] ss:$12 sps:$4 sm:$0xff]   ;;  %v2875_v8 = vld [vmem:[#allocation4 + $0x1c8] ss:$12 sps:$4 sm:$0xff]  }
  0x62   :  { %2619 = vmatprep.subr.bf16.mxu1 %v2888_v36  ;;  %v2882_v9 = vld [vmem:[#allocation4 + $0x1e4] ss:$12 sps:$4 sm:$0xff]   ;;  %v2929_v10 = vld [vmem:[#allocation4 + $0x200] ss:$12 sps:$4 sm:$0xff]   ;;  %v90_v12 = vld [vmem:[#allocation2 + $0x18] sm:$0xff] }
  0x63   :  { %v2933_v11 = vld [vmem:[#allocation4 + $0x2d8] ss:$12 sps:$4 sm:$0xff]   ;;  %v96_v13 = vld [vmem:[#allocation2 + $0x48] sm:$0xff]  ;;  %v2938_v18 = vld [vmem:[#allocation4 + $0x2f0] ss:$12 sps:$4 sm:$0xff]  }
  0x64   :  { %1095 = vmatpush1.bf16.msra.mxu0 %v2832_v16  ;;  %v102_v14 = vpack.c.bf16 %v96_v13, %v90_v12  ;;  %v2880_v15 = vld [vmem:[#allocation4 + $0x1e0] ss:$12 sps:$4 sm:$0xff]   ;;  %v2887_v16 = vld [vmem:[#allocation4 + $0x1fc] ss:$12 sps:$4 sm:$0xff]   ;;  %v2885_v19 = vld [vmem:[#allocation4 + $0x1f8] ss:$12 sps:$4 sm:$0xff]  }
  0x65   :  { %1096 = vmatprep.subr.bf16.mxu0 %v2833_v17  ;;  %2620 = vmatpush3.bf16.msra.mxu1 %v2889_v39  ;;  %v2934_v17 = vld [vmem:[#allocation4 + $0x218] ss:$12 sps:$4 sm:$0xff]   ;;  %v89_v22 = vld [vmem:[#allocation2 + $0x10] sm:$0xff]  ;;  %v2948_v29 = vld [vmem:[#allocation4 + $0x3e0] ss:$12 sps:$4 sm:$0xff]  }
  0x66   :  { %2621 = vmatprep.subr.bf16.mxu1 %v2893_v40  ;;  %v95_v23 = vld [vmem:[#allocation2 + $0x40] sm:$0xff]  ;;  %v2944_v27 = vld [vmem:[#allocation4 + $0x308] ss:$12 sps:$4 sm:$0xff]   ;;  %v2959_v40 = vld [vmem:[#allocation4 + $0x350] ss:$12 sps:$4 sm:$0xff]  }
  0x67   :  { %v3350_v26 = vpack.c.bf16 %v95_v23, %v89_v22  ;;  %v2895_v30 = vld [vmem:[#allocation4 + $0x228] ss:$12 sps:$4 sm:$0xff]   ;;  %v2953_v33 = vld [vmem:[#allocation4 + $0x3f8] ss:$12 sps:$4 sm:$0xff]   ;;  %v2900_v34 = vld [vmem:[#allocation4 + $0x240] ss:$12 sps:$4 sm:$0xff]  }
  0x68   :  { %1097 = vmatpush1.bf16.msra.mxu0 %v2835_v20  ;;  %v2939_v20 = vld [vmem:[#allocation4 + $0x230] ss:$12 sps:$4 sm:$0xff]   ;;  %v2954_v36 = vld [vmem:[#allocation4 + $0x338] ss:$12 sps:$4 sm:$0xff]   ;;  %v2912_v39 = vld [vmem:[#allocation4 + $0x274] ss:$12 sps:$4 sm:$0xff]  }
  0x69   :  { %1098 = vmatprep.subr.bf16.mxu0 %v2836_v21  ;;  %2622 = vmatpush3.bf16.msra.mxu1 %v2894_v43  ;;  %v2892_v21 = vld [vmem:[#allocation4 + $0x214] ss:$12 sps:$4 sm:$0xff]   ;;  %v2917_v43 = vld [vmem:[#allocation4 + $0x28c] ss:$12 sps:$4 sm:$0xff]   ;;  %v2922_v50 = vld [vmem:[#allocation4 + $0x2a4] ss:$12 sps:$4 sm:$0xff]  }
  0x6a   :  { %2623 = vmatprep.subr.bf16.mxu1 %v2898_v44  ;;  %v2964_v44 = vld [vmem:[#allocation4 + $0x368] ss:$12 sps:$4 sm:$0xff]   ;;  %v2969_v51 = vld [vmem:[#allocation4 + $0x380] ss:$12 sps:$4 sm:$0xff]   ;;  %v2945_v12 = vld [vmem:[#allocation4 + $0x318] ss:$12 sps:$4 sm:$0xff]  }
  0x6b   :  { %v2952_v13 = vld [vmem:[#allocation4 + $0x334] ss:$12 sps:$4 sm:$0xff]   ;;  %v3018_v23 = vld [vmem:[#allocation6 + $0x64] ss:$12 sps:$4 sm:$0xff]  }
  0x6c   :  { %1099 = vmatpush1.bf16.msra.mxu0 %v2838_v24  ;;  %v2943_v24 = vld [vmem:[#allocation4 + $0x3c8] ss:$12 sps:$4 sm:$0xff]   ;;  %v3016_v22 = vld [vmem:[#allocation6 + $0x60] ss:$12 sps:$4 sm:$0xff]  }
  0x6d   :  { %1100 = vmatprep.subr.bf16.mxu0 %v2839_v25  ;;  %2624 = vmatpush3.bf16.msra.mxu1 %v2899_v47  ;;  %v2890_v25 = vld [vmem:[#allocation4 + $0x210] ss:$12 sps:$4 sm:$0xff]  }
  0x6e   :  { %2631 = vmatprep.subr.bf16.mxu1 %v2903_v48  ;;  %v98_v47 = vld [vmem:[#allocation2 + $0x58] sm:$0xff]  ;;  %v2915_v48 = vld [vmem:[#allocation4 + $0x288] ss:$12 sps:$4 sm:$0xff]  }
  0x70   :  { %1101 = vmatpush1.bf16.msra.mxu0 %v2841_v28  ;;  %1244 = vmatmul.mubr.bf16.vlgmr.msra.gmra.mrb[0].mxu1 %v99_v54  ;;  %v2897_v28 = vld [vmem:[#allocation4 + $0x22c] ss:$12 sps:$4 sm:$0xff]  }
  0x71   :  { %1102 = vmatprep.subr.bf16.mxu0 %v2842_v31  ;;  %2632 = vmatpush3.bf16.msra.mxu1 %v2904_v53  ;;  %v2902_v31 = vld [vmem:[#allocation4 + $0x244] ss:$12 sps:$4 sm:$0xff]   ;;  %v2920_v53 = vld [vmem:[#allocation4 + $0x2a0] ss:$12 sps:$4 sm:$0xff]  }
  0x72   :  { %2633 = vmatprep.subr.bf16.mxu1 %v2908_v55  ;;  %1284 = vmatprep.mubr.bf16.mxu1 %v102_v14  ;;  %v2974_v55 = vld [vmem:[#allocation4 + $0x398] ss:$12 sps:$4 sm:$0xff]  }
  0x74   :  { %1103 = vmatpush1.bf16.msra.mxu0 %v2844_v32  ;;  %v2949_v32 = vld [vmem:[#allocation4 + $0x320] ss:$12 sps:$4 sm:$0xff]  }
  0x75   :  { %1104 = vmatprep.subr.bf16.mxu0 %v2845_v35  ;;  %2634 = vmatpush3.bf16.msra.mxu1 %v2909_v57  ;;  %v2907_v35 = vld [vmem:[#allocation4 + $0x25c] ss:$12 sps:$4 sm:$0xff]   ;;  %v2925_v57 = vld [vmem:[#allocation4 + $0x2b8] ss:$12 sps:$4 sm:$0xff]  }
  0x76   :  { %2635 = vmatprep.subr.bf16.mxu1 %v2913_v59  ;;  %v91_v59 = vld [vmem:[#allocation2 + $0x20] sm:$0xff] }
  0x78   :  { %1105 = vmatpush1.bf16.msra.mxu0 %v2847_v37  ;;  %v2958_v37 = vld [vmem:[#allocation4 + $0x410] ss:$12 sps:$4 sm:$0xff]  }
  0x79   :  { %1106 = vmatprep.subr.bf16.mxu0 %v2848_v38  ;;  %2636 = vmatpush3.bf16.msra.mxu1 %v2914_v62  ;;  %v2905_v38 = vld [vmem:[#allocation4 + $0x258] ss:$12 sps:$4 sm:$0xff]  }
  0x7a   :  { %2637 = vmatprep.subr.bf16.mxu1 %v2918_v63  ;;  %v3006_v62 = vld [vmem:[#allocation6 + $0x4] ss:$12 sps:$4 sm:$0xff]  }
  0x7b   :  { %v2930_v63 = vld [vmem:[#allocation4 + $0x2d0] ss:$12 sps:$4 sm:$0xff]  }
  0x7c   :  { %1107 = vmatpush1.bf16.msra.mxu0 %v2850_v41  ;;  %v2963_v41 = vld [vmem:[#allocation4 + $0x428] ss:$12 sps:$4 sm:$0xff]  }
  0x7d   :  { %1108 = vmatprep.subr.bf16.mxu0 %v2851_v42  ;;  %2638 = vmatpush3.bf16.msra.mxu1 %v2919_v2  ;;  %v2910_v42 = vld [vmem:[#allocation4 + $0x270] ss:$12 sps:$4 sm:$0xff]   ;;  %v3004_v2 = vld [vmem:[#allocation6] ss:$12 sps:$4 sm:$0xff]  }
  0x7e   :  { %2639 = vmatprep.subr.bf16.mxu1 %v2923_v3  ;;  %v3009_v3 = vld [vmem:[#allocation6 + $0x1c] ss:$12 sps:$4 sm:$0xff]  }
  0x80   :  { %1109 = vmatpush1.bf16.msra.mxu0 %v2853_v45  ;;  %v2968_v45 = vld [vmem:[#allocation4 + $0x440] ss:$12 sps:$4 sm:$0xff]  }
  0x81   :  { %1110 = vmatprep.subr.bf16.mxu0 %v2854_v46  ;;  %2640 = vmatpush3.bf16.msra.mxu1 %v2924_v6  ;;  %v92_v46 = vld [vmem:[#allocation2 + $0x28] sm:$0xff]  ;;  %v2942_v6 = vld [vmem:[#allocation4 + $0x304] ss:$12 sps:$4 sm:$0xff]  }
  0x82   :  { %2641 = vmatprep.subr.bf16.mxu1 %v2928_v7  ;;  %v3012_v7 = vld [vmem:[#allocation6 + $0x34] ss:$12 sps:$4 sm:$0xff]  }
  0x84   :  { %1111 = vmatpush1.bf16.msra.mxu0 %v2856_v49  ;;  %v104_v49 = vpack.c.bf16 %v98_v47, %v92_v46  ;;  %v3022_v46 = vld [vmem:[#allocation6 + $0x90] ss:$12 sps:$4 sm:$0xff]   ;;  %v3024_v47 = vld [vmem:[#allocation6 + $0x94] ss:$12 sps:$4 sm:$0xff]  }
  0x85   :  { %1112 = vmatprep.subr.bf16.mxu0 %v2857_v52  ;;  %2642 = vmatpush3.bf16.msra.mxu1 %v2929_v10  ;;  %v2973_v52 = vld [vmem:[#allocation4 + $0x458] ss:$12 sps:$4 sm:$0xff]   ;;  %v3010_v10 = vld [vmem:[#allocation6 + $0x30] ss:$12 sps:$4 sm:$0xff]  }
  0x86   :  { %2643 = vmatprep.subr.bf16.mxu1 %v2933_v11  ;;  %v3015_v11 = vld [vmem:[#allocation6 + $0x4c] ss:$12 sps:$4 sm:$0xff]  }
  0x88   :  { %1113 = vmatpush1.bf16.msra.mxu0 %v2859_v56  ;;  %v2978_v56 = vld [vmem:[#allocation4 + $0x470] ss:$12 sps:$4 sm:$0xff]  }
  0x89   :  { %1125 = vmatprep.subr.bf16.mxu0 %v2862_v58  ;;  %2644 = vmatpush3.bf16.msra.mxu1 %v2934_v17  ;;  %v2979_v58 = vld [vmem:[#allocation4 + $0x3b0] ss:$12 sps:$4 sm:$0xff]   ;;  %v2955_v17 = vld [vmem:[#allocation4 + $0x348] ss:$12 sps:$4 sm:$0xff]  }
  0x8a   :  { %2645 = vmatprep.subr.bf16.mxu1 %v2938_v18  ;;  %v2962_v18 = vld [vmem:[#allocation4 + $0x364] ss:$12 sps:$4 sm:$0xff]  }
  0x8b   :  { %1115 = vmatmul.mubr.bf16.vlgmr.msra.gmra.mrb[0].mxu0 %v99_v54  ;;  %v2927_v54 = vld [vmem:[#allocation4 + $0x2bc] ss:$12 sps:$4 sm:$0xff]  }
  0x8c   :  { %1126 = vmatpush1.bf16.msra.mxu0 %v2860_v60  ;;  %1157 = vmatprep.mubr.bf16.mxu0 %v102_v14  ;;  %v97_v60 = vld [vmem:[#allocation2 + $0x50] sm:$0xff] }
  0x8d   :  { %1127 = vmatprep.subr.bf16.mxu0 %v2867_v61  ;;  %2646 = vmatpush3.bf16.msra.mxu1 %v2939_v20  ;;  %v2932_v61 = vld [vmem:[#allocation4 + $0x2d4] ss:$12 sps:$4 sm:$0xff]   ;;  %v2967_v20 = vld [vmem:[#allocation4 + $0x37c] ss:$12 sps:$4 sm:$0xff]  }
  0x8e   :  { %2653 = vmatprep.subr.bf16.mxu1 %v2943_v24  ;;  %v3013_v14 = vld [vmem:[#allocation6 + $0x48] ss:$12 sps:$4 sm:$0xff]  }
  0x8f   :  { %v2972_v24 = vld [vmem:[#allocation4 + $0x394] ss:$12 sps:$4 sm:$0xff]  }
  0x90   :  { %1128 = vmatpush1.bf16.msra.mxu0 %v2865_v0  ;;  %1285 = vmatmul.mubr.bf16.vlgmr.msra.gmra.mrb[4].mxu1 %v3350_v26  ;;  %v3353_v0 = vpack.c.bf16 %v97_v60, %v91_v59  ;;  %v3040_v59 = vld [vmem:[#allocation6 + $0xf4] ss:$12 sps:$4 sm:$0xff]   ;;  %v3042_v60 = vld [vmem:[#allocation6 + $0x38] ss:$12 sps:$4 sm:$0xff]  }
  0x91   :  { %1129 = vmatprep.subr.bf16.mxu0 %v2872_v1  ;;  %2654 = vmatpush3.bf16.msra.mxu1 %v2944_v27  ;;  %v2937_v1 = vld [vmem:[#allocation4 + $0x2ec] ss:$12 sps:$4 sm:$0xff]   ;;  %v2975_v27 = vld [vmem:[#allocation4 + $0x3a8] ss:$12 sps:$4 sm:$0xff]  }
  0x92   :  { %2655 = vmatprep.subr.bf16.mxu1 %v2948_v29  ;;  %1325 = vmatprep.mubr.bf16.mxu1 %v104_v49  ;;  %v2980_v29 = vld [vmem:[#allocation4 + $0x3c0] ss:$12 sps:$4 sm:$0xff]  }
  0x94   :  { %1130 = vmatpush1.bf16.msra.mxu0 %v2870_v4  ;;  %v2935_v4 = vld [vmem:[#allocation4 + $0x2e8] ss:$12 sps:$4 sm:$0xff]  }
  0x95   :  { %1131 = vmatprep.subr.bf16.mxu0 %v2877_v5  ;;  %2656 = vmatpush3.bf16.msra.mxu1 %v2949_v32  ;;  %v3007_v5 = vld [vmem:[#allocation6 + $0x18] ss:$12 sps:$4 sm:$0xff]   ;;  %v2988_v32 = vld [vmem:[#allocation4 + $0x3f4] ss:$12 sps:$4 sm:$0xff]  }
  0x96   :  { %2657 = vmatprep.subr.bf16.mxu1 %v2953_v33  ;;  %v2986_v33 = vld [vmem:[#allocation4 + $0x3f0] ss:$12 sps:$4 sm:$0xff]  }
  0x98   :  { %1132 = vmatpush1.bf16.msra.mxu0 %v2875_v8  ;;  %v2940_v8 = vld [vmem:[#allocation4 + $0x300] ss:$12 sps:$4 sm:$0xff]  }
  0x99   :  { %1133 = vmatprep.subr.bf16.mxu0 %v2882_v9  ;;  %2658 = vmatpush3.bf16.msra.mxu1 %v2954_v36  ;;  %v2947_v9 = vld [vmem:[#allocation4 + $0x31c] ss:$12 sps:$4 sm:$0xff]   ;;  %v2994_v36 = vld [vmem:[#allocation4 + $0x424] ss:$12 sps:$4 sm:$0xff]  }
  0x9a   :  { %2659 = vmatprep.subr.bf16.mxu1 %v2958_v37  ;;  %v2992_v37 = vld [vmem:[#allocation4 + $0x420] ss:$12 sps:$4 sm:$0xff]  }
  0x9c   :  { %1134 = vmatpush1.bf16.msra.mxu0 %v2880_v15  ;;  %v2950_v15 = vld [vmem:[#allocation4 + $0x330] ss:$12 sps:$4 sm:$0xff]  }
  0x9d   :  { %1135 = vmatprep.subr.bf16.mxu0 %v2887_v16  ;;  %2660 = vmatpush3.bf16.msra.mxu1 %v2959_v40  ;;  %v2957_v16 = vld [vmem:[#allocation4 + $0x34c] ss:$12 sps:$4 sm:$0xff]   ;;  %v3021_v40 = vld [vmem:[#allocation6 + $0x7c] ss:$12 sps:$4 sm:$0xff]  }
  0x9e   :  { %2661 = vmatprep.subr.bf16.mxu1 %v2963_v41  ;;  %v2995_v41 = vld [vmem:[#allocation4 + $0x438] ss:$12 sps:$4 sm:$0xff]  }
  0xa0   :  { %1136 = vmatpush1.bf16.msra.mxu0 %v2885_v19  ;;  %v2960_v19 = vld [vmem:[#allocation4 + $0x360] ss:$12 sps:$4 sm:$0xff]  }
  0xa1   :  { %1137 = vmatprep.subr.bf16.mxu0 %v2892_v21  ;;  %2662 = vmatpush3.bf16.msra.mxu1 %v2964_v44  ;;  %v2965_v21 = vld [vmem:[#allocation4 + $0x378] ss:$12 sps:$4 sm:$0xff]  }
  0xa2   :  { %2663 = vmatprep.subr.bf16.mxu1 %v2968_v45  ;;  %v3003_v44 = vld [vmem:[#allocation4 + $0x46c] ss:$12 sps:$4 sm:$0xff]   ;;  %v3001_v45 = vld [vmem:[#allocation4 + $0x468] ss:$12 sps:$4 sm:$0xff]  }
  0xa4   :  { %1138 = vmatpush1.bf16.msra.mxu0 %v2890_v25  ;;  %v2970_v25 = vld [vmem:[#allocation4 + $0x390] ss:$12 sps:$4 sm:$0xff]  }
  0xa5   :  { %1139 = vmatprep.subr.bf16.mxu0 %v2897_v28  ;;  %2664 = vmatpush3.bf16.msra.mxu1 %v2969_v51  ;;  %v2982_v28 = vld [vmem:[#allocation4 + $0x3c4] ss:$12 sps:$4 sm:$0xff]   ;;  %v3031_v51 = vld [vmem:[#allocation6 + $0xc8] ss:$12 sps:$4 sm:$0xff]  }
  0xa6   :  { %2665 = vmatprep.subr.bf16.mxu1 %v2973_v52  ;;  %v3032_v52 = vld [vmem:[#allocation6 + $0x8] ss:$12 sps:$4 sm:$0xff]  }
  0xa8   :  { %1140 = vmatpush1.bf16.msra.mxu0 %v2895_v30  ;;  %v2985_v30 = vld [vmem:[#allocation4 + $0x3dc] ss:$12 sps:$4 sm:$0xff]  }
  0xa9   :  { %1141 = vmatprep.subr.bf16.mxu0 %v2902_v31  ;;  %2666 = vmatpush3.bf16.msra.mxu1 %v2974_v55  ;;  %v2983_v31 = vld [vmem:[#allocation4 + $0x3d8] ss:$12 sps:$4 sm:$0xff]   ;;  %v3035_v55 = vld [vmem:[#allocation6 + $0xdc] ss:$12 sps:$4 sm:$0xff]  }
  0xaa   :  { %2667 = vmatprep.subr.bf16.mxu1 %v2978_v56  ;;  %v3037_v56 = vld [vmem:[#allocation6 + $0x20] ss:$12 sps:$4 sm:$0xff]  }
  0xac   :  { %1142 = vmatpush1.bf16.msra.mxu0 %v2900_v34  ;;  %v2991_v34 = vld [vmem:[#allocation4 + $0x40c] ss:$12 sps:$4 sm:$0xff]  }
  0xad   :  { %1143 = vmatprep.subr.bf16.mxu0 %v2907_v35  ;;  %2668 = vmatpush3.bf16.msra.mxu1 %v2979_v58  ;;  %v2989_v35 = vld [vmem:[#allocation4 + $0x408] ss:$12 sps:$4 sm:$0xff]   ;;  %v3033_v58 = vld [vmem:[#allocation6 + $0xd8] ss:$12 sps:$4 sm:$0xff]  }
  0xae   :  { %1840 = vmatprep.subr.bf16.mxu1 %v3006_v62  ;;  %v3038_v62 = vld [vmem:[#allocation6 + $0xf0] ss:$12 sps:$4 sm:$0xff]  }
  0xb0   :  { %1144 = vmatpush1.bf16.msra.mxu0 %v2905_v38  ;;  %1326 = vmatmul.mubr.bf16.vlgmr.msra.gmra.mrb[8].mxu1 %v3353_v0  ;;  %v2997_v38 = vld [vmem:[#allocation4 + $0x43c] ss:$12 sps:$4 sm:$0xff]  }
  0xb1   :  { %1145 = vmatprep.subr.bf16.mxu0 %v2912_v39  ;;  %1841 = vmatpush1.bf16.msra.mxu1 %v3004_v2  ;;  %v3019_v39 = vld [vmem:[#allocation6 + $0x78] ss:$12 sps:$4 sm:$0xff]   ;;  %v3043_v2 = vld [vmem:[#allocation6 + $0x108] ss:$12 sps:$4 sm:$0xff]  }
  0xb2   :  { %1842 = vmatprep.subr.bf16.mxu1 %v3009_v3  ;;  %v3050_v3 = vld [vmem:[#allocation6 + $0x124] ss:$12 sps:$4 sm:$0xff]  }
  0xb4   :  { %1146 = vmatpush1.bf16.msra.mxu0 %v2910_v42  ;;  %v3000_v42 = vld [vmem:[#allocation4 + $0x454] ss:$12 sps:$4 sm:$0xff]  }
  0xb5   :  { %1147 = vmatprep.subr.bf16.mxu0 %v2917_v43  ;;  %1843 = vmatpush1.bf16.msra.mxu1 %v3007_v5  ;;  %v2998_v43 = vld [vmem:[#allocation4 + $0x450] ss:$12 sps:$4 sm:$0xff]   ;;  %v3056_v5 = vld [vmem:[#allocation6 + $0x140] ss:$12 sps:$4 sm:$0xff]  }
  0xb6   :  { %1844 = vmatprep.subr.bf16.mxu1 %v3012_v7  ;;  %v3055_v7 = vld [vmem:[#allocation6 + $0x13c] ss:$12 sps:$4 sm:$0xff]  }
  0xb8   :  { %1148 = vmatpush1.bf16.msra.mxu0 %v2915_v48  ;;  %v3025_v48 = vld [vmem:[#allocation6 + $0xa8] ss:$12 sps:$4 sm:$0xff]  }
  0xb9   :  { %1149 = vmatprep.subr.bf16.mxu0 %v2922_v50  ;;  %1845 = vmatpush1.bf16.msra.mxu1 %v3010_v10  ;;  %v3030_v50 = vld [vmem:[#allocation6 + $0xc4] ss:$12 sps:$4 sm:$0xff]  }
  0xba   :  { %1846 = vmatprep.subr.bf16.mxu1 %v3015_v11 }
  0xbc   :  { %1150 = vmatpush1.bf16.msra.mxu0 %v2920_v53  ;;  %v3036_v53 = vld [vmem:[#allocation6 + $0xe0] ss:$12 sps:$4 sm:$0xff]  }
  0xbd   :  { %1151 = vmatprep.subr.bf16.mxu0 %v2927_v54  ;;  %1847 = vmatpush1.bf16.msra.mxu1 %v3013_v14  ;;  %v3028_v54 = vld [vmem:[#allocation6 + $0xc0] ss:$12 sps:$4 sm:$0xff]  }
  0xbe   :  { %1848 = vmatprep.subr.bf16.mxu1 %v3018_v23  ;;  %v3067_v23 = vld [vmem:[#allocation6 + $0xb0] ss:$12 sps:$4 sm:$0xff]  }
  0xc0   :  { %1152 = vmatpush1.bf16.msra.mxu0 %v2925_v57  ;;  %v3041_v57 = vld [vmem:[#allocation6 + $0xf8] ss:$12 sps:$4 sm:$0xff]  }
  0xc1   :  { %1153 = vmatprep.subr.bf16.mxu0 %v2932_v61  ;;  %1849 = vmatpush1.bf16.msra.mxu1 %v3016_v22  ;;  %v3046_v61 = vld [vmem:[#allocation6 + $0x110] ss:$12 sps:$4 sm:$0xff]  }
  0xc2   :  { %1850 = vmatprep.subr.bf16.mxu1 %v3021_v40  ;;  %v3066_v22 = vld [vmem:[#allocation6 + $0x170] ss:$12 sps:$4 sm:$0xff]   ;;  %v3236_v40 = vmov 0  }
  0xc3   :  { %2810 = vset.pattern.permute.xlu1 %v3236_v40  ;;  %2811 = vset.pattern.permute.xlu0 %v3236_v40 }
  0xc4   :  { %1154 = vmatpush1.bf16.msra.mxu0 %v2930_v63  ;;  %v3045_v63 = vld [vmem:[#allocation6 + $0x10c] ss:$12 sps:$4 sm:$0xff]  }
  0xc5   :  { %1155 = vmatprep.subr.bf16.mxu0 %v2937_v1  ;;  %1851 = vmatpush1.bf16.msra.mxu1 %v3019_v39  ;;  %v3051_v1 = vld [vmem:[#allocation6 + $0x128] ss:$12 sps:$4 sm:$0xff]  }
  0xc6   :  { %1852 = vmatprep.subr.bf16.mxu1 %v3024_v47 }
  0xc8   :  { %1156 = vmatpush1.bf16.msra.mxu0 %v2935_v4  ;;  %v3052_v4 = vld [vmem:[#allocation6 + $0x68] ss:$12 sps:$4 sm:$0xff]  }
  0xc9   :  { %1168 = vmatprep.subr.bf16.mxu0 %v2942_v6  ;;  %1853 = vmatpush1.bf16.msra.mxu1 %v3022_v46  ;;  %v3048_v6 = vld [vmem:[#allocation6 + $0x120] ss:$12 sps:$4 sm:$0xff]  }
  0xcb   :  { %1158 = vmatmul.mubr.bf16.vlgmr.msra.gmra.mrb[0].mxu0 %v3350_v26  ;;  %v2977_v26 = vld [vmem:[#allocation4 + $0x3ac] ss:$12 sps:$4 sm:$0xff]  }
  0xcc   :  { %1169 = vmatpush1.bf16.msra.mxu0 %v2940_v8  ;;  %1200 = vmatprep.mubr.bf16.mxu0 %v104_v49  ;;  %v3027_v49 = vld [vmem:[#allocation6 + $0xac] ss:$12 sps:$4 sm:$0xff]  }
  0xcd   :  { %1170 = vmatprep.subr.bf16.mxu0 %v2947_v9  ;;  %1854 = vmatprep.subr.bf16.mxu1 %v3027_v49  ;;  %v3053_v8 = vld [vmem:[#allocation6 + $0x138] ss:$12 sps:$4 sm:$0xff]  }
  0xce   :  { %1855 = vmatpush1.bf16.msra.mxu1 %v3025_v48 }
  0xcf   :  { %1856 = vmatprep.subr.bf16.mxu1 %v3030_v50 }
  0xd0   :  { %1171 = vmatpush1.bf16.msra.mxu0 %v2945_v12 }
  0xd1   :  { %1172 = vmatprep.subr.bf16.mxu0 %v2952_v13 }
  0xd2   :  { %1857 = vmatpush1.bf16.msra.mxu1 %v3028_v54 }
  0xd3   :  { %1858 = vmatprep.subr.bf16.mxu1 %v3035_v55 }
  0xd4   :  { %1173 = vmatpush1.bf16.msra.mxu0 %v2950_v15  ;;  %v3057_v15 = vld [vmem:[#allocation6 + $0x80] ss:$12 sps:$4 sm:$0xff]  }
  0xd5   :  { %1174 = vmatprep.subr.bf16.mxu0 %v2957_v16  ;;  %v3060_v16 = vld [vmem:[#allocation6 + $0x154] ss:$12 sps:$4 sm:$0xff]  }
  0xd6   :  { %1859 = vmatpush1.bf16.msra.mxu1 %v3033_v58 }
  0xd7   :  { %1860 = vmatprep.subr.bf16.mxu1 %v3040_v59 }
  0xd8   :  { %1175 = vmatpush1.bf16.msra.mxu0 %v2955_v17  ;;  %v3058_v17 = vld [vmem:[#allocation6 + $0x150] ss:$12 sps:$4 sm:$0xff]  }
  0xd9   :  { %1176 = vmatprep.subr.bf16.mxu0 %v2962_v18  ;;  %v3061_v18 = vld [vmem:[#allocation6 + $0x158] ss:$12 sps:$4 sm:$0xff]  }
  0xda   :  { %1861 = vmatpush1.bf16.msra.mxu1 %v3038_v62 }
  0xdb   :  { %1862 = vmatprep.subr.bf16.mxu1 %v3045_v63 }
  0xdc   :  { %1177 = vmatpush1.bf16.msra.mxu0 %v2960_v19  ;;  %v3062_v19 = vld [vmem:[#allocation6 + $0x98] ss:$12 sps:$4 sm:$0xff]  }
  0xdd   :  { %1178 = vmatprep.subr.bf16.mxu0 %v2967_v20  ;;  %v3065_v20 = vld [vmem:[#allocation6 + $0x16c] ss:$12 sps:$4 sm:$0xff]  }
  0xde   :  { %1863 = vmatpush1.bf16.msra.mxu1 %v3043_v2 }
  0xdf   :  { %1864 = vmatprep.subr.bf16.mxu1 %v3050_v3 }
  0xe0   :  { %1179 = vmatpush1.bf16.msra.mxu0 %v2965_v21  ;;  %v3063_v21 = vld [vmem:[#allocation6 + $0x168] ss:$12 sps:$4 sm:$0xff]  }
  0xe1   :  { %1180 = vmatprep.subr.bf16.mxu0 %v2972_v24  ;;  %v299_v24 = vlaneseq }
  0xe2   :  { %1865 = vmatpush1.bf16.msra.mxu1 %v3048_v6  ;;  %v3068_v6 = vld [vmem:[#allocation6 + $0x180] ss:$12 sps:$4 sm:$0xff]  }
  0xe3   :  { %1866 = vmatprep.subr.bf16.mxu1 %v3055_v7  ;;  %v3073_v7 = vld [vmem:[#allocation6 + $0x19c] ss:$12 sps:$4 sm:$0xff]  }
  0xe4   :  { %1181 = vmatpush1.bf16.msra.mxu0 %v2970_v25  ;;  %v3070_v25 = vld [vmem:[#allocation6 + $0x184] ss:$12 sps:$4 sm:$0xff]  }
  0xe5   :  { %1182 = vmatprep.subr.bf16.mxu0 %v2977_v26  ;;  %v3359_v26 = vshrl.u32 %v299_v24, 7 }
  0xe6   :  { %1867 = vmatpush1.bf16.msra.mxu1 %v3053_v8  ;;  %v3071_v8 = vld [vmem:[#allocation6 + $0x198] ss:$12 sps:$4 sm:$0xff]  }
  0xe7   :  { %1868 = vmatprep.subr.bf16.mxu1 %v3060_v16  ;;  %v3083_v16 = vld [vmem:[#allocation6 + $0x1f8] ss:$12 sps:$4 sm:$0xff]  }
  0xe8   :  { %1183 = vmatpush1.bf16.msra.mxu0 %v2975_v27  ;;  %v309_v27 = vsub.s32 2, %v3359_v26 }
  0xe9   :  { %1184 = vmatprep.subr.bf16.mxu0 %v2982_v28  ;;  %v297_v28 = vld [vmem:[%s3427_s2] sm:$0x7] }
  0xea   :  { %1869 = vmatpush1.bf16.msra.mxu1 %v3058_v17  ;;  %v3088_v17 = vld [vmem:[#allocation6 + $0x214] ss:$12 sps:$4 sm:$0xff]  }
  0xeb   :  { %1870 = vmatprep.subr.bf16.mxu1 %v3065_v20  ;;  %v3089_v20 = vld [vmem:[#allocation6 + $0x228] ss:$12 sps:$4 sm:$0xff]  }
  0xec   :  { %1185 = vmatpush1.bf16.msra.mxu0 %v2980_v29  ;;  %v310_v29 = vrot.slane %v297_v28, %v309_v27 }
  0xed   :  { %1186 = vmatprep.subr.bf16.mxu0 %v2985_v30 }
  0xee   :  { %1871 = vmatpush1.bf16.msra.mxu1 %v3063_v21  ;;  %v3092_v21 = vld [vmem:[#allocation6 + $0x188] ss:$12 sps:$4 sm:$0xff]  }
  0xef   :  { %1883 = vmatprep.subr.bf16.mxu1 %v3070_v25  ;;  %v3094_v25 = vld [vmem:[#allocation6 + $0x1b8] ss:$12 sps:$4 sm:$0xff]  }
  0xf0   :  { %1187 = vmatpush1.bf16.msra.mxu0 %v2983_v31 }
  0xf1   :  { %1188 = vmatprep.subr.bf16.mxu0 %v2988_v32 }
  0xf4   :  { %1189 = vmatpush1.bf16.msra.mxu0 %v2986_v33 }
  0xf5   :  { %1190 = vmatprep.subr.bf16.mxu0 %v2991_v34 }
  0xf8   :  { %1191 = vmatpush1.bf16.msra.mxu0 %v2989_v35 }
  0xf9   :  { %1192 = vmatprep.subr.bf16.mxu0 %v2994_v36 }
  0xfc   :  { %1193 = vmatpush1.bf16.msra.mxu0 %v2992_v37 }
  0xfd   :  { %1194 = vmatprep.subr.bf16.mxu0 %v2997_v38 }
 0x100   :  { %1195 = vmatpush1.bf16.msra.mxu0 %v2995_v41 }
 0x101   :  { %1196 = vmatprep.subr.bf16.mxu0 %v3000_v42 }
 0x104   :  { %1197 = vmatpush1.bf16.msra.mxu0 %v2998_v43 }
 0x105   :  { %1198 = vmatprep.subr.bf16.mxu0 %v3003_v44 }
 0x108   :  { %1199 = vmatpush1.bf16.msra.mxu0 %v3001_v45 }
 0x109   :  { %2675 = vmatprep.subr.bf16.mxu0 %v3031_v51 }
 0x10b   :  { %1201 = vmatmul.mubr.bf16.vlgmr.msra.gmra.mrb[0].mxu0 %v3353_v0  ;;  %v3047_v0 = vld [vmem:[#allocation6 + $0x50] ss:$12 sps:$4 sm:$0xff]  }
 0x10c   :  { %2676 = vmatpush3.bf16.msra.mxu0 %v3032_v52  ;;  %v301_v52 = vsub.s32 0, %v3359_v26 }
 0x10d   :  { %2677 = vmatprep.subr.bf16.mxu0 %v3036_v53  ;;  %v305_v53 = vsub.s32 1, %v3359_v26  ;;  %v2575_v26 = vld [vmem:[%s3431_s6] ss:$0 sm:$0xff] }
 0x10e   :  { %v302_v54 = vrot.slane %v297_v28, %v301_v52 }
 0x10f   :  { %v306_v55 = vrot.slane %v297_v28, %v305_v53  ;;  %v3095_v28 = vld [vmem:[#allocation6 + $0x1d0] ss:$12 sps:$4 sm:$0xff]  }
 0x110   :  { %2678 = vmatpush3.bf16.msra.mxu0 %v3037_v56 }
 0x111   :  { %2679 = vmatprep.subr.bf16.mxu0 %v3041_v57 }
 0x114   :  { %2680 = vmatpush3.bf16.msra.mxu0 %v3042_v60 }
 0x115   :  { %2681 = vmatprep.subr.bf16.mxu0 %v3046_v61 }
 0x118   :  { %2682 = vmatpush3.bf16.msra.mxu0 %v3047_v0 }
 0x119   :  { %2683 = vmatprep.subr.bf16.mxu0 %v3051_v1 }
 0x11c   :  { %2684 = vmatpush3.bf16.msra.mxu0 %v3052_v4 }
 0x11d   :  { %2685 = vmatprep.subr.bf16.mxu0 %v3056_v5 }
 0x120   :  { %2686 = vmatpush3.bf16.msra.mxu0 %v3057_v15  ;;  %v3085_v15 = vld [vmem:[#allocation6 + $0x1fc] ss:$12 sps:$4 sm:$0xff]  }
 0x121   :  { %2687 = vmatprep.subr.bf16.mxu0 %v3061_v18  ;;  %v3086_v18 = vld [vmem:[#allocation6 + $0x210] ss:$12 sps:$4 sm:$0xff]  }
 0x124   :  { %2688 = vmatpush3.bf16.msra.mxu0 %v3062_v19  ;;  %v3091_v19 = vld [vmem:[#allocation6 + $0x22c] ss:$12 sps:$4 sm:$0xff]  }
 0x125   :  { %2689 = vmatprep.subr.bf16.mxu0 %v3066_v22  ;;  %v3237_v22 = vmov 0.0  }
 0x128   :  { %2690 = vmatpush3.bf16.msra.mxu0 %v3067_v23  ;;  %v3093_v23 = vld [vmem:[#allocation6 + $0x1a0] ss:$12 sps:$4 sm:$0xff]  }
 0x143   :  { %v2625_v9 = vpop.f32.mrb[0].mxu1 }
 0x144   :  { %v2626_v10 = vpop.f32.mrb[1].mxu1 }
 0x145   :  { %v2627_v11 = vadd.f32 %v2626_v10, %v2625_v9  ;;  %v2628_v12 = vpop.f32.mrb[2].mxu1  ;;  %v3076_v9 = vld [vmem:[#allocation6 + $0x1b4] ss:$12 sps:$4 sm:$0xff]   ;;  %v3074_v10 = vld [vmem:[#allocation6 + $0x1b0] ss:$12 sps:$4 sm:$0xff]  }
 0x146   :  { %v2629_v13 = vpop.f32.mrb[3].mxu1 }
 0x147   :  { %v2630_v14 = vadd.f32 %v2629_v13, %v2628_v12  ;;  %v1246_v30 = vadd.f32 %v2627_v11, %v310_v29  ;;  %v3079_v11 = vld [vmem:[#allocation6 + $0x1cc] ss:$12 sps:$4 sm:$0xff]   ;;  %v3077_v12 = vld [vmem:[#allocation6 + $0x1c8] ss:$12 sps:$4 sm:$0xff]   ;;  %v3082_v13 = vld [vmem:[#allocation6 + $0x1e4] ss:$12 sps:$4 sm:$0xff]  }
 0x149   :  { %v1249_v33 = vadd.f32 %v2630_v14, %v310_v29  ;;  %v3080_v14 = vld [vmem:[#allocation6 + $0x1e0] ss:$12 sps:$4 sm:$0xff]   ;;  %v3096_v29 = vld [vmem:[#allocation6 + $0x1e8] ss:$12 sps:$4 sm:$0xff]  }
 0x163   :  { %v2647_v31 = vpop.f32.mrb[4].mxu1 }
 0x164   :  { %v2648_v32 = vpop.f32.mrb[5].mxu1 }
 0x165   :  { %v2649_v34 = vadd.f32 %v2648_v32, %v2647_v31  ;;  %v2650_v35 = vpop.f32.mrb[6].mxu1  ;;  %v3098_v31 = vld [vmem:[#allocation6 + $0x218] ss:$12 sps:$4 sm:$0xff]   ;;  %v3099_v32 = vld [vmem:[#allocation6 + $0x230] ss:$12 sps:$4 sm:$0xff]  }
 0x166   :  { %v2651_v36 = vpop.f32.mrb[7].mxu1 }
 0x167   :  { %v1287_v37 = vadd.f32 %v2649_v34, %v1246_v30  ;;  %v2652_v38 = vadd.f32 %v2651_v36, %v2650_v35  ;;  %v3097_v30 = vld [vmem:[#allocation6 + $0x200] ss:$12 sps:$4 sm:$0xff]  }
 0x168   :  { %v3101_v34 = vld [vmem:[#allocation7] sm:$0xff]   ;;  %v3102_v35 = vld [vmem:[#allocation7 + $0x48] sm:$0xff]  }
 0x169   :  { %v1290_v39 = vadd.f32 %v2652_v38, %v1249_v33  ;;  %v3100_v33 = vld [vmem:[#allocation7 + $0x40] sm:$0xff]   ;;  %v3103_v36 = vld [vmem:[#allocation7 + $0x8] sm:$0xff]   ;;  %v3105_v38 = vld [vmem:[#allocation7 + $0x10] sm:$0xff]  }
 0x16a   :  { %2706 = vmatprep.subr.bf16.mxu0 %v3100_v33  ;;  %v2303_v33 = vand.u32 127, %v299_v24 }
 0x16c   :  { %vm2306_vm1 = vcmp.lt.s32.totalorder %v2303_v33, 3 }
 0x183   :  { %v2669_v41 = vpop.f32.mrb[8].mxu1 }
 0x184   :  { %v2670_v42 = vpop.f32.mrb[9].mxu1 }
 0x185   :  { %v2671_v43 = vadd.f32 %v2670_v42, %v2669_v41  ;;  %v2672_v44 = vpop.f32.mrb[10].mxu1  ;;  %v3108_v41 = vld [vmem:[#allocation7 + $0x60] sm:$0xff]  }
 0x186   :  { %v2673_v45 = vpop.f32.mrb[11].mxu1  ;;  %v3109_v42 = vld [vmem:[#allocation7 + $0x20] sm:$0xff]  }
 0x187   :  { %v1328_v46 = vadd.f32 %v2671_v43, %v1287_v37  ;;  %v2674_v47 = vadd.f32 %v2673_v45, %v2672_v44  ;;  %v3104_v37 = vld [vmem:[#allocation7 + $0x50] sm:$0xff]   ;;  %v3110_v43 = vld [vmem:[#allocation7 + $0x68] sm:$0xff]  }
 0x188   :  { %v3111_v44 = vld [vmem:[#allocation7 + $0x28] sm:$0xff]   ;;  %v3112_v45 = vld [vmem:[#allocation7 + $0x70] sm:$0xff]  }
 0x189   :  { %v1336_v48 = vmax.f32 %v1328_v46, 0.0  ;;  %v1331_v49 = vadd.f32 %v2674_v47, %v1290_v39  ;;  %v3106_v39 = vld [vmem:[#allocation7 + $0x58] sm:$0xff]   ;;  %v3113_v46 = vld [vmem:[#allocation7 + $0x30] sm:$0xff]  }
 0x18a   :  { %v3114_v47 = vld [vmem:[#allocation7 + $0x78] sm:$0xff]  }
 0x18b   :  { %v1339_v50 = vmax.f32 %v1331_v49, 0.0  ;;  %v3116_v49 = vld [vmem:[#allocation7 + $0x80] sm:$0xff]  }
 0x18d   :  { %v3367_v51 = vpack.c.bf16 %v1339_v50, %v1336_v48  ;;  %v3115_v48 = vld [vmem:[#allocation7 + $0x38] sm:$0xff]   ;;  %v3117_v50 = vld [vmem:[#allocation7 + $0x88] sm:$0xff]  }
 0x1de   :  { %v1202_v56 = vpop.f32.mrb[0].mxu0 }
 0x1df   :  { %v2777_v57 = vadd.f32 %v1202_v56, %v302_v54  ;;  %v1204_v58 = vpop.f32.mrb[1].mxu0  ;;  %v3121_v56 = vld [vmem:[#allocation7 + $0xa8] sm:$0xff]  }
 0x1e0   :  { %v2778_v59 = vadd.f32 %v1204_v58, %v306_v55  ;;  %v1206_v60 = vpop.f32.mrb[2].mxu0  ;;  %v3123_v58 = vld [vmem:[#allocation7 + $0xb8] sm:$0xff]  }
 0x1e1   :  { %v2779_v61 = vadd.f32 %v1206_v60, %v302_v54  ;;  %v1208_v62 = vpop.f32.mrb[3].mxu0  ;;  %v1334_v0 = vmax.f32 %v2777_v57, 0.0  ;;  %v3119_v54 = vld [vmem:[#allocation7 + $0x98] sm:$0xff]   ;;  %v3122_v57 = vld [vmem:[#allocation7 + $0xb0] sm:$0xff]   ;;  %v2305_v60 = vld [vmem:[%s3432_s7 + $0x8] sm:$0xff] }
 0x1e2   :  { %v2780_v63 = vadd.f32 %v1208_v62, %v306_v55  ;;  %v1335_v2 = vmax.f32 %v2778_v59, 0.0  ;;  %v3120_v55 = vld [vmem:[#allocation7 + $0xa0] sm:$0xff]  }
 0x1e3   :  { %v1337_v1 = vmax.f32 %v2779_v61, 0.0  ;;  %v2304_v59 = vld [vmem:[%s3432_s7] sm:$0xff] }
 0x1e4   :  { %v1338_v3 = vmax.f32 %v2780_v63, 0.0  ;;  %2330 = vperm.xlu1 %2810, %v2304_v59  }
 0x1e5   :  { %v1340_v4 = vpack.c.bf16 %v1337_v1, %v1334_v0 }
 0x1e6   :  { %v1341_v5 = vpack.c.bf16 %v1338_v3, %v1335_v2  ;;  %v1439_v3 = vld [vmem:[%s3429_s4] sm:$0x7] }
 0x1e8   :  { %1872 = vmatprep.mubr.bf16.mxu1 %v1341_v5  ;;  %1958 = vmatprep.mubr.bf16.mxu0 %v1341_v5 }
 0x1e9   :  { %1873 = vmatmul.mubr.bf16.vlgmr.msra.gmra.mrb[12].mxu1 %v1340_v4  ;;  %1959 = vmatmul.mubr.bf16.vlgmr.msra.gmra.mrb[4].mxu0 %v1340_v4  ;;  %v1444_v4 = vrot.slane %v1439_v3, %v301_v52 }
 0x1ea   :  { %1884 = vmatpush1.bf16.msra.mxu1 %v3068_v6  ;;  %1915 = vmatprep.mubr.bf16.mxu1 %v3236_v40  ;;  %v3107_v40 = vld [vmem:[#allocation7 + $0x18] sm:$0xff]   ;;  %v1448_v6 = vrot.slane %v1439_v3, %v305_v53 }
 0x1eb   :  { %1885 = vmatprep.subr.bf16.mxu1 %v3073_v7  ;;  %2707 = vmatpush3.bf16.msra.mxu0 %v3101_v34 }
 0x1ec   :  { %2708 = vmatprep.subr.bf16.mxu0 %v3102_v35  ;;  %2333 = vperm.xlu1 %2810, %v2305_v60  }
 0x1ee   :  { %1886 = vmatpush1.bf16.msra.mxu1 %v3071_v8 }
 0x1ef   :  { %1887 = vmatprep.subr.bf16.mxu1 %v3076_v9  ;;  %2709 = vmatpush3.bf16.msra.mxu0 %v3103_v36 }
 0x1f0   :  { %2710 = vmatprep.subr.bf16.mxu0 %v3104_v37 }
 0x1f2   :  { %1888 = vmatpush1.bf16.msra.mxu1 %v3074_v10 }
 0x1f3   :  { %1889 = vmatprep.subr.bf16.mxu1 %v3079_v11  ;;  %2711 = vmatpush3.bf16.msra.mxu0 %v3105_v38 }
 0x1f4   :  { %2712 = vmatprep.subr.bf16.mxu0 %v3106_v39 }
 0x1f6   :  { %1890 = vmatpush1.bf16.msra.mxu1 %v3077_v12 }
 0x1f7   :  { %1891 = vmatprep.subr.bf16.mxu1 %v3082_v13  ;;  %2713 = vmatpush3.bf16.msra.mxu0 %v3107_v40 }
 0x1f8   :  { %2714 = vmatprep.subr.bf16.mxu0 %v3108_v41 }
 0x1fa   :  { %1892 = vmatpush1.bf16.msra.mxu1 %v3080_v14 }
 0x1fb   :  { %1893 = vmatprep.subr.bf16.mxu1 %v3085_v15  ;;  %2715 = vmatpush3.bf16.msra.mxu0 %v3109_v42 }
 0x1fc   :  { %2716 = vmatprep.subr.bf16.mxu0 %v3110_v43 }
 0x1fe   :  { %1894 = vmatpush1.bf16.msra.mxu1 %v3083_v16  ;;  %v1452_v16 = vrot.slane %v1439_v3, %v309_v27 }
 0x1ff   :  { %1895 = vmatprep.subr.bf16.mxu1 %v3088_v17  ;;  %2717 = vmatpush3.bf16.msra.mxu0 %v3111_v44 }
 0x200   :  { %2718 = vmatprep.subr.bf16.mxu0 %v3112_v45 }
 0x202   :  { %1896 = vmatpush1.bf16.msra.mxu1 %v3086_v18 }
 0x203   :  { %1897 = vmatprep.subr.bf16.mxu1 %v3091_v19  ;;  %2719 = vmatpush3.bf16.msra.mxu0 %v3113_v46 }
 0x204   :  { %2720 = vmatprep.subr.bf16.mxu0 %v3114_v47 }
 0x206   :  { %1898 = vmatpush1.bf16.msra.mxu1 %v3089_v20 }
 0x207   :  { %2737 = vmatprep.subr.bf16.mxu1 %v3237_v22  ;;  %2721 = vmatpush3.bf16.msra.mxu0 %v3115_v48 }
 0x209   :  { %1916 = vmatmul.mubr.bf16.vlgmr.msra.gmra.mrb[12].mxu1 %v3367_v51 }
 0x20a   :  { %2738 = vmatpush3.bf16.msra.mxu1 %v3092_v21  ;;  %2753 = vmatprep.mubr.msk.bf16.mxu1 %vm3238_vm0, %v3237_v22 }
 0x20b   :  { %2739 = vmatprep.subr.bf16.mxu1 %v3237_v22 }
 0x20e   :  { %2740 = vmatpush3.bf16.msra.mxu1 %v3093_v23 }
 0x20f   :  { %2741 = vmatprep.subr.bf16.mxu1 %v3237_v22 }
 0x212   :  { %2742 = vmatpush3.bf16.msra.mxu1 %v3094_v25 }
 0x213   :  { %2743 = vmatprep.subr.bf16.mxu1 %v3237_v22 }
 0x216   :  { %2744 = vmatpush3.bf16.msra.mxu1 %v3095_v28 }
 0x217   :  { %2745 = vmatprep.subr.bf16.mxu1 %v3237_v22 }
 0x21a   :  { %2746 = vmatpush3.bf16.msra.mxu1 %v3096_v29 }
 0x21b   :  { %2747 = vmatprep.subr.bf16.mxu1 %v3237_v22 }
 0x21e   :  { %2748 = vmatpush3.bf16.msra.mxu1 %v3097_v30 }
 0x21f   :  { %2749 = vmatprep.subr.bf16.mxu1 %v3237_v22 }
 0x222   :  { %2750 = vmatpush3.bf16.msra.mxu1 %v3098_v31 }
 0x223   :  { %2751 = vmatprep.subr.bf16.mxu1 %v3237_v22 }
 0x226   :  { %2752 = vmatpush3.bf16.msra.mxu1 %v3099_v32 }
 0x227   :  { %2757 = vmatprep.subr.bf16.mxu1 %v3237_v22 }
 0x229   :  { %2754 = vmatmul.mubr.bf16.vlgmr.msra.gmra.mrb[16].mxu1 %v3367_v51  ;;  %v3118_v51 = vld [vmem:[#allocation7 + $0x90] sm:$0xff]  }
 0x22a   :  { %2773 = vmatprep.mubr.msk.bf16.mxu1 %vm3238_vm0, %v3237_v22  ;;  %2758 = vmatpush3.bf16.msra.mxu1 %v3116_v49 }
 0x22b   :  { %2759 = vmatprep.subr.bf16.mxu1 %v3237_v22 }
 0x22e   :  { %2760 = vmatpush3.bf16.msra.mxu1 %v3117_v50 }
 0x22f   :  { %2761 = vmatprep.subr.bf16.mxu1 %v3237_v22 }
 0x232   :  { %2762 = vmatpush3.bf16.msra.mxu1 %v3118_v51 }
 0x233   :  { %2763 = vmatprep.subr.bf16.mxu1 %v3237_v22 }
 0x236   :  { %2764 = vmatpush3.bf16.msra.mxu1 %v3119_v54 }
 0x237   :  { %2765 = vmatprep.subr.bf16.mxu1 %v3237_v22 }
 0x23a   :  { %2766 = vmatpush3.bf16.msra.mxu1 %v3120_v55 }
 0x23b   :  { %2767 = vmatprep.subr.bf16.mxu1 %v3237_v22 }
 0x23e   :  { %2768 = vmatpush3.bf16.msra.mxu1 %v3121_v56 }
 0x23f   :  { %2769 = vmatprep.subr.bf16.mxu1 %v3237_v22 }
 0x242   :  { %2770 = vmatpush3.bf16.msra.mxu1 %v3122_v57 }
 0x243   :  { %2771 = vmatprep.subr.bf16.mxu1 %v3237_v22 }
 0x246   :  { %2772 = vmatpush3.bf16.msra.mxu1 %v3123_v58 }
 0x263   :  { %v2331_v49 = vpop.permute.xlu1 %2330 }
 0x264   :  { %vm2335_vm2 = vcmp.eq.s32.totalorder %v2303_v33, %v2331_v49 }
 0x26b   :  { %v2334_v51 = vpop.permute.xlu1 %2333 }
 0x26c   :  { %vm2336_vm3 = vcmp.eq.s32.totalorder %v2303_v33, %v2334_v51 }
 0x2bc   :  { %v2691_v61 = vpop.f32.mrb[4].mxu0 }
 0x2bd   :  { %v2692_v62 = vpop.f32.mrb[5].mxu0 }
 0x2be   :  { %v2693_v63 = vadd.f32 %v2692_v62, %v2691_v61  ;;  %v2694_v0 = vpop.f32.mrb[6].mxu0 }
 0x2bf   :  { %v2695_v1 = vpop.f32.mrb[7].mxu0 }
 0x2c0   :  { %v2696_v2 = vadd.f32 %v2695_v1, %v2694_v0  ;;  %v1961_v17 = vadd.f32 %v2693_v63, %v1452_v16 }
 0x2c2   :  { %v1964_v20 = vadd.f32 %v2696_v2, %v1452_v16 }
 0x2dc   :  { %v1917_v5 = vpop.f32.mrb[12].mxu1 }
 0x2dd   :  { %v1919_v7 = vpop.f32.mrb[13].mxu1  ;;  %v2781_v9 = vadd.f32 %v1917_v5, %v1444_v4 }
 0x2de   :  { %v1921_v8 = vpop.f32.mrb[14].mxu1  ;;  %v2782_v12 = vadd.f32 %v1919_v7, %v1448_v6 }
 0x2df   :  { %v2783_v10 = vadd.f32 %v1921_v8, %v1444_v4  ;;  %v1923_v11 = vpop.f32.mrb[15].mxu1 }
 0x2e0   :  { %v2784_v13 = vadd.f32 %v1923_v11, %v1448_v6 }
 0x2e1   :  { %v2008_v14 = vpack.c.bf16 %v2783_v10, %v2781_v9 }
 0x2e2   :  { %v2009_v15 = vpack.c.bf16 %v2784_v13, %v2782_v12 }
 0x2e4   :  { %2242 = vmatprep.mubr.bf16.mxu0 %v2009_v15 }
 0x2e5   :  { %2243 = vmatmul.mubr.bf16.vlgmr.msra.gmra.mrb[8].mxu0 %v2008_v14 }
 0x2fc   :  { %v2001_v52 = vpop.f32.mrb[16].mxu1 }
 0x2fd   :  { %v2002_v18 = vadd.f32 %v2001_v52, %v1961_v17  ;;  %v2755_v19 = vpop.f32.mrb[17].mxu1 }
 0x2fe   :  { %v2004_v53 = vpop.f32.mrb[18].mxu1 }
 0x2ff   :  { %v2005_v21 = vadd.f32 %v2004_v53, %v1964_v20  ;;  %v2756_v22 = vpop.f32.mrb[19].mxu1 }
 0x301   :  { %v2010_v23 = vpack.c.bf16 %v2005_v21, %v2002_v18 }
 0x303   :  { %2774 = vmatmul.mubr.bf16.vlgmr.msra.gmra.mrb[20].mxu1 %v2010_v23 }
 0x3b8   :  { %v2722_v25 = vpop.f32.mrb[8].mxu0 }
 0x3b9   :  { %v2723_v28 = vpop.f32.mrb[9].mxu0 }
 0x3ba   :  { %v2724_v29 = vadd.f32 %v2723_v28, %v2722_v25  ;;  %v2725_v30 = vpop.f32.mrb[10].mxu0 }
 0x3bb   :  { %v2726_v31 = vpop.f32.mrb[11].mxu0 }
 0x3bc   :  { %v2727_v32 = vadd.f32 %v2726_v31, %v2725_v30  ;;  %v2245_v27 = vadd.f32 %v2724_v29, %v2575_v26 }
 0x3be   :  { %v2248_v37 = vadd.f32 %v2727_v32, %v2575_v26 }
 0x3d6   :  { %v2285_v34 = vpop.f32.mrb[20].mxu1 }
 0x3d7   :  { %v2286_v35 = vadd.f32 %v2285_v34, %v2245_v27  ;;  %v2775_v36 = vpop.f32.mrb[21].mxu1 }
 0x3d8   :  { %v2288_v38 = vpop.f32.mrb[22].mxu1 }
 0x3d9   :  { %v2289_v39 = vadd.f32 %v2288_v38, %v2248_v37  ;;  %v2776_v40 = vpop.f32.mrb[23].mxu1  ;;  %v2307_v41 = vsel %vm2306_vm1, %v2286_v35, -1e+30 }
 0x3da   :  { %2309 = vmax.xlane.f32.xlu0 %v2307_v41  ;;  %v2337_v55 = vsel %vm2335_vm2, %v2307_v41, 0.0 }
 0x3db   :  { %v2607_v42 = vpack.c.bf16 %v2289_v39, %v2286_v35  ;;  %v2308_v24 = vsel %vm2306_vm1, %v2289_v39, -1e+30 }
 0x3dc   :  { %v2338_v56 = vsel %vm2336_vm3, %v2308_v24, 0.0 }
 0x3dd   :  { %2608 = vst [vmem:[%s3433_s8] sm:$0xff] %v2607_v42  }
 0x3de   :  { %2311 = vmax.xlane.f32.xlu0 %v2308_v24 }
 0x467   :  { %v2310_v43 = vpop.xlane.xlu0 %2309 }
 0x468   :  { %v2313_v44 = vsub.f32 %v2307_v41, %v2310_v43 }
 0x46a   :  { %v2315_v45 = vmul.f32 1.442695, %v2313_v44 }
 0x46b   :  { %v2312_v46 = vpop.xlane.xlu0 %2311 }
 0x46c   :  { %3124 = vpow2.f32 %v2315_v45  ;;  %v2314_v47 = vsub.f32 %v2308_v24, %v2312_v46 }
 0x46e   :  { %v2317_v48 = vmul.f32 1.442695, %v2314_v47 }
 0x470   :  { %3126 = vpow2.f32 %v2317_v48 }
 0x476   :  { %v3125_v50 = vpop.eup %3124 }
 0x477   :  { %2319 = vadd.xlane.f32.xlu0 %v3125_v50 }
 0x47a   :  { %v3127_v54 = vpop.eup %3126 }
 0x47b   :  { %2321 = vadd.xlane.f32.xlu1 %v3127_v54  ;;  %2339 = vadd.xlane.f32.xlu0 %v2337_v55 }
 0x47f   :  { %2341 = vadd.xlane.f32.xlu0 %v2338_v56 }
 0x504   :  { %v2320_v57 = vpop.xlane.xlu0 %2319 }
 0x505   :  { %3128 = vlog2.f32 %v2320_v57 }
 0x508   :  { %v2322_v58 = vpop.xlane.xlu1 %2321  ;;  %v2340_v61 = vpop.xlane.xlu0 %2339 }
 0x509   :  { %3130 = vlog2.f32 %v2322_v58 }
 0x50c   :  { %v2342_v3 = vpop.xlane.xlu0 %2341 }
 0x50f   :  { %v3129_v59 = vpop.eup %3128 }
 0x510   :  { %v2324_v60 = vmul.f32 0.6931472, %v3129_v59 }
 0x512   :  { %v2327_v62 = vadd.f32 %v2324_v60, %v2310_v43 }
 0x513   :  { %v3131_v63 = vpop.eup %3130 }
 0x514   :  { %v2326_v0 = vmul.f32 0.6931472, %v3131_v63  ;;  %v2343_v1 = vsub.f32 %v2327_v62, %v2340_v61 }
 0x516   :  { %2346 = vst.msk [vmem:[%s3434_s9] sm:$0xff] %vm2345_vm4, %v2343_v1  ;;  %v2328_v2 = vadd.f32 %v2326_v0, %v2312_v46 }
 0x518   :  { %v2344_v4 = vsub.f32 %v2328_v2, %v2342_v3 }
 0x51a   :  { %2347 = vst.msk [vmem:[%s3434_s9 + $0x8] sm:$0xff] %vm2345_vm4, %v2344_v4 }
 0x51b   :  { %2356 = vsyncpa [#allocation3], 1 }
 0x51c   :  { %2357 = vsyncpa [#allocation5], 1 }
 0x51d   :  { %2358 = vsyncpa [#allocation8], 1 }

</bundles_post_ra>
